<compile_context>
chip_gen: v6e
topology: v6e:2x2x1
jax: 0.10.0
libtpu: 0.0.40
codegen_flags: <defaults>
</compile_context>

<pallas_src>
import jax
import jax.numpy as jnp
from jax.experimental import pallas as pl
from jax.experimental.pallas import tpu as pltpu


C_IN = 1056
C_MID = 264
C_OUT = 1056
LANE = 128


def _round_up(x, m):
    return ((x + m - 1) // m) * m


def _cdiv(a, b):
    return -(-a // b)


C_MID_PAD = _round_up(C_MID, LANE)   # 384 = 3 * 128 (zero-padded hidden dim)


def _mlp_kernel(x_ref, w1_ref, b1_ref, w2_ref, b2_ref, o_ref):
    # First 1x1 conv: (TM, C_IN) @ (C_IN, C_MID_PAD), f32 accumulation on MXU.
    h = jnp.dot(x_ref[...], w1_ref[...], preferred_element_type=jnp.float32)
    # Bias + ReLU in f32 (v5e VPU has no bf16).
    h = jnp.maximum(h + b1_ref[...], 0.0)
    # Second 1x1 conv: (TM, C_MID_PAD) @ (C_MID_PAD, C_OUT), f32 accumulation.
    y = jnp.dot(h.astype(w2_ref.dtype), w2_ref[...],
                preferred_element_type=jnp.float32)
    o_ref[...] = (y + b2_ref[...]).astype(o_ref.dtype)


def prepare_params(w1, b1, w2, b2):
    """One-time weight prep (hoisted out of the per-call path).

    Zero-pads the hidden dim 264 -> 384 (exact: zero W1 cols -> relu(0)=0 ->
    zero W2 rows contribute 0) and casts weights to bf16; biases stay f32."""
    pad_mid = C_MID_PAD - C_MID
    w1_p = jnp.pad(w1, ((0, 0), (0, pad_mid))).astype(jnp.bfloat16)
    b1_p = jnp.pad(b1, (0, pad_mid)).reshape(1, C_MID_PAD).astype(jnp.float32)
    w2_p = jnp.pad(w2, ((0, pad_mid), (0, 0))).astype(jnp.bfloat16)
    b2_p = b2.reshape(1, C_OUT).astype(jnp.float32)
    return w1_p, b1_p, w2_p, b2_p


def conv_relu_conv(x_nchw, params, *, tm=1024, out_dtype=jnp.float32):
    """x_nchw: (N, C_IN, H, W) float32.
    params: output of prepare_params() (pre-padded bf16 weights, f32 biases).
    Returns (N, C_OUT, H, W) in out_dtype (f32 default, matching PyTorch)."""
    w1_p, b1_p, w2_p, b2_p = params
    N, C, H, W = x_nchw.shape
    assert C == C_IN
    M = N * H * W

    # NCHW -> (M, C) channel-last. For H=W=1 this is a pure reshape (no copy).
    if H == 1 and W == 1:
        x_2d = x_nchw.reshape(M, C).astype(jnp.bfloat16)
    else:
        # Cast BEFORE the transpose so the HBM round trip moves bf16, not f32.
        x_2d = jnp.transpose(x_nchw.astype(jnp.bfloat16),
                             (0, 2, 3, 1)).reshape(M, C)

    # Balanced row tiles: at most `tm` rows each, multiple of 8 (sublane), and
    # >= 2 tiles whenever M > 8 so both v7x TensorCores get work.
    n_tiles = max(_cdiv(M, tm), 2 if M > 8 else 1)
    tm_eff = _round_up(_cdiv(M, n_tiles), 8)
    grid_m = _cdiv(M, tm_eff)
    m_pad = grid_m * tm_eff
    if m_pad != M:
        x_2d = jnp.pad(x_2d, ((0, m_pad - M), (0, 0)))

    resident = pl.Buffered(1)   # grid-invariant operands: single-buffer

    out_2d = pl.pallas_call(
        _mlp_kernel,
        out_shape=jax.ShapeDtypeStruct((m_pad, C_OUT), out_dtype),
        grid=(grid_m,),
        in_specs=[
            pl.BlockSpec((tm_eff, C_IN), lambda i: (i, 0)),
            # Weights / biases: constant index_map -> VMEM-resident, 1 buffer.
            pl.BlockSpec((C_IN, C_MID_PAD), lambda i: (0, 0),
                         pipeline_mode=resident),
            pl.BlockSpec((1, C_MID_PAD), lambda i: (0, 0),
                         pipeline_mode=resident),
            pl.BlockSpec((C_MID_PAD, C_OUT), lambda i: (0, 0),
                         pipeline_mode=resident),
            pl.BlockSpec((1, C_OUT), lambda i: (0, 0),
                         pipeline_mode=resident),
        ],
        out_specs=pl.BlockSpec((tm_eff, C_OUT), lambda i: (i, 0)),
        compiler_params=pltpu.CompilerParams(
            dimension_semantics=("parallel",),
            vmem_limit_bytes=48 * 1024 * 1024,
        ),
    )(x_2d, w1_p, b1_p, w2_p, b2_p)

    out_2d = out_2d[:M]
    if H == 1 and W == 1:
        return out_2d.reshape(N, C_OUT, 1, 1)
    return jnp.transpose(out_2d.reshape(N, H, W, C_OUT), (0, 3, 1, 2))


def init_params(key):
    """Deterministic init mimicking PyTorch Conv2d default (uniform ±1/sqrt(fan_in)).
    Weights stored as (C_in, C_out) so y = x @ W + b."""
    k1, k2, k3, k4 = jax.random.split(key, 4)
    bound1 = 1.0 / jnp.sqrt(jnp.float32(C_IN))
    bound2 = 1.0 / jnp.sqrt(jnp.float32(C_MID))
    w1 = jax.random.uniform(k1, (C_IN, C_MID), jnp.float32, -bound1, bound1)
    b1 = jax.random.uniform(k2, (C_MID,), jnp.float32, -bound1, bound1)
    w2 = jax.random.uniform(k3, (C_MID, C_OUT), jnp.float32, -bound2, bound2)
    b2 = jax.random.uniform(k4, (C_OUT,), jnp.float32, -bound2, bound2)
    return w1, b1, w2, b2


def _reference(x_nchw, w1, b1, w2, b2):
    """Plain-JAX reference using the same bf16-input / f32-accumulate math.
    (bf16 inputs => ~1e-2 rel error vs PyTorch f32 Conv2d; documented trade-off.)"""
    N, C, H, W = x_nchw.shape
    x2 = jnp.transpose(x_nchw, (0, 2, 3, 1)).reshape(N * H * W, C)
    x2 = x2.astype(jnp.bfloat16)
    w1b = w1.astype(jnp.bfloat16)
    w2b = w2.astype(jnp.bfloat16)
    h = jnp.dot(x2, w1b, preferred_element_type=jnp.float32) + b1
    h = jnp.maximum(h, 0.0)
    y = jnp.dot(h.astype(jnp.bfloat16), w2b,
                preferred_element_type=jnp.float32) + b2
    return jnp.transpose(y.reshape(N, H, W, C_OUT), (0, 3, 1, 2))


if __name__ == "__main__":
    key = jax.random.PRNGKey(0)
    kx, kx2, kp = jax.random.split(key, 3)

    w1, b1, w2, b2 = init_params(kp)
    params = jax.tree_util.tree_map(jax.block_until_ready,
                                    prepare_params(w1, b1, w2, b2))

    conv_fn = jax.jit(conv_relu_conv, static_argnames=("tm", "out_dtype"))

    # Primary check: the module's own shape convention (N, 1056, 1, 1).
    N, H, W = 2, 1, 1
    x = jax.random.normal(kx, (N, C_IN, H, W), dtype=jnp.float32)
    out = jax.block_until_ready(conv_fn(x, params))
    ref = _reference(x, w1, b1, w2, b2)
    assert out.shape == (N, C_OUT, H, W)
    assert jnp.allclose(out, ref, atol=1e-2, rtol=1e-2)

    # Secondary check: spatial extent > 1 exercises the bf16-first transpose
    # path and a multi-tile grid (>= 2 tiles, balanced).
    N2, H2, W2 = 1, 4, 4
    x2 = jax.random.normal(kx2, (N2, C_IN, H2, W2), dtype=jnp.float32)
    out2 = jax.block_until_ready(conv_fn(x2, params))
    ref2 = _reference(x2, w1, b1, w2, b2)
    assert out2.shape == (N2, C_OUT, H2, W2)
    assert jnp.allclose(out2, ref2, atol=1e-2, rtol=1e-2)

    print("KERNEL_OK")
</pallas_src>

<mosaic_0001>
module attributes {stable_mosaic.version = 11 : i64} {
  func.func @_mlp_kernel(%arg0: i32, %arg1: memref<8x1056xbf16, #tpu.memory_space<vmem>>, %arg2: memref<1056x384xbf16, #tpu.memory_space<vmem>>, %arg3: memref<1x384xf32, #tpu.memory_space<vmem>>, %arg4: memref<384x1056xbf16, #tpu.memory_space<vmem>>, %arg5: memref<1x1056xf32, #tpu.memory_space<vmem>>, %arg6: memref<8x1056xf32, #tpu.memory_space<vmem>>) attributes {dimension_semantics = [#tpu.dimension_semantics<parallel>], iteration_bounds = array<i64: 1>, scalar_prefetch = 0 : i64, scratch_operands = 0 : i64, tpu.core_type = #tpu.core_type<tc>, window_params = [{transform_indices = @transform_0, window_bounds = array<i64: 8, 1056>}, {pipeline_mode = #tpu.pipeline_mode<synchronous>, transform_indices = @transform_1, window_bounds = array<i64: 1056, 384>}, {pipeline_mode = #tpu.pipeline_mode<synchronous>, transform_indices = @transform_2, window_bounds = array<i64: 1, 384>}, {pipeline_mode = #tpu.pipeline_mode<synchronous>, transform_indices = @transform_3, window_bounds = array<i64: 384, 1056>}, {pipeline_mode = #tpu.pipeline_mode<synchronous>, transform_indices = @transform_4, window_bounds = array<i64: 1, 1056>}, {transform_indices = @transform_5, window_bounds = array<i64: 8, 1056>}]} {
    %c0 = arith.constant 0 : index
    %c0_0 = arith.constant 0 : index
    %0 = vector.load %arg1[%c0, %c0_0] : memref<8x1056xbf16, #tpu.memory_space<vmem>>, vector<8x1056xbf16>
    %c0_1 = arith.constant 0 : index
    %c0_2 = arith.constant 0 : index
    %1 = vector.load %arg2[%c0_1, %c0_2] : memref<1056x384xbf16, #tpu.memory_space<vmem>>, vector<1056x384xbf16>
    %cst = arith.constant dense<0.000000e+00> : vector<8x384xf32>
    %2 = tpu.matmul %0, %1, %cst {dimension_numbers = #tpu.dot_dimension_numbers<[1], [0], [0], [1], [0, 0, 1, 1], [], []>} : vector<8x1056xbf16>, vector<1056x384xbf16>, vector<8x384xf32> -> vector<8x384xf32>
    %c0_3 = arith.constant 0 : index
    %c0_4 = arith.constant 0 : index
    %3 = vector.load %arg3[%c0_3, %c0_4] : memref<1x384xf32, #tpu.memory_space<vmem>>, vector<1x384xf32>
    %4 = vector.broadcast %3 : vector<1x384xf32> to vector<8x384xf32>
    %5 = arith.addf %2, %4 : vector<8x384xf32>
    %cst_5 = arith.constant 0.000000e+00 : f32
    %6 = vector.broadcast %cst_5 : f32 to vector<8x384xf32>
    %7 = arith.maximumf %5, %6 : vector<8x384xf32>
    %8 = arith.truncf %7 : vector<8x384xf32> to vector<8x384xbf16>
    %c0_6 = arith.constant 0 : index
    %c0_7 = arith.constant 0 : index
    %9 = vector.load %arg4[%c0_6, %c0_7] : memref<384x1056xbf16, #tpu.memory_space<vmem>>, vector<384x1056xbf16>
    %cst_8 = arith.constant dense<0.000000e+00> : vector<8x1056xf32>
    %10 = tpu.matmul %8, %9, %cst_8 {dimension_numbers = #tpu.dot_dimension_numbers<[1], [0], [0], [1], [0, 0, 1, 1], [], []>} : vector<8x384xbf16>, vector<384x1056xbf16>, vector<8x1056xf32> -> vector<8x1056xf32>
    %c0_9 = arith.constant 0 : index
    %c0_10 = arith.constant 0 : index
    %11 = vector.load %arg5[%c0_9, %c0_10] : memref<1x1056xf32, #tpu.memory_space<vmem>>, vector<1x1056xf32>
    %12 = vector.broadcast %11 : vector<1x1056xf32> to vector<8x1056xf32>
    %13 = arith.addf %10, %12 : vector<8x1056xf32>
    %c0_11 = arith.constant 0 : index
    %c0_12 = arith.constant 0 : index
    %14 = vector.load %arg6[%c0_11, %c0_12] : memref<8x1056xf32, #tpu.memory_space<vmem>>, vector<8x1056xf32>
    tpu.vector_store %arg6[%c0_11, %c0_12], %13 {strides = array<i32>} : memref<8x1056xf32, #tpu.memory_space<vmem>>, vector<8x1056xf32>,
    return
  }
  func.func @transform_0(%arg0: i32) -> (i32, i32) {
    %c0_i32 = arith.constant 0 : i32
    %c0_i32_0 = arith.constant 0 : i32
    return %arg0, %c0_i32 : i32, i32
  }
  func.func @transform_1(%arg0: i32) -> (i32, i32) {
    %c0_i32 = arith.constant 0 : i32
    %c0_i32_0 = arith.constant 0 : i32
    %c0_i32_1 = arith.constant 0 : i32
    return %c0_i32, %c0_i32_0 : i32, i32
  }
  func.func @transform_2(%arg0: i32) -> (i32, i32) {
    %c0_i32 = arith.constant 0 : i32
    %c0_i32_0 = arith.constant 0 : i32
    %c0_i32_1 = arith.constant 0 : i32
    return %c0_i32, %c0_i32_0 : i32, i32
  }
  func.func @transform_3(%arg0: i32) -> (i32, i32) {
    %c0_i32 = arith.constant 0 : i32
    %c0_i32_0 = arith.constant 0 : i32
    %c0_i32_1 = arith.constant 0 : i32
    return %c0_i32, %c0_i32_0 : i32, i32
  }
  func.func @transform_4(%arg0: i32) -> (i32, i32) {
    %c0_i32 = arith.constant 0 : i32
    %c0_i32_0 = arith.constant 0 : i32
    %c0_i32_1 = arith.constant 0 : i32
    return %c0_i32, %c0_i32_0 : i32, i32
  }
  func.func @transform_5(%arg0: i32) -> (i32, i32) {
    %c0_i32 = arith.constant 0 : i32
    %c0_i32_0 = arith.constant 0 : i32
    return %arg0, %c0_i32 : i32, i32
  }
}

</mosaic_0001>

<bundles_post_ra>
// kernel: conv_relu_conv.1
= control target key start
LH: loop header
LB: loop body
LE: loop exit
PB: predicated region body
PF: predicated region fallthrough
CT: control target
= control target key end

     0   :  { %vm1394_vm0 = vcmask 261120   ;;  %vm4789_vm1 = vmmov 0   ;;  %s6247_s1 = inlined_call_operand.vmem [shape: bf16[1056,384], index: 1, kind: input, shape index: {}]   ;;  %s6248_s0 = inlined_call_operand.vmem [shape: bf16[8,1056], index: 0, kind: input, shape index: {}]   ;;  %s6249_s3 = inlined_call_operand.vmem [shape: bf16[384,1056], index: 3, kind: input, shape index: {}]   ;;  %s6250_s2 = inlined_call_operand.vmem [shape: f32[1,384], index: 2, kind: input, shape index: {}]   ;;  %s6251_s4 = inlined_call_operand.vmem [shape: f32[1,1056], index: 4, kind: input, shape index: {}]   ;;  %s6252_s5 = inlined_call_operand.vmem [shape: f32[8,1056], index: 5, kind: output, shape index: {}]  }
   0x1   :  { %v4202_v0 = vld [vmem:[%s6247_s1 + $0xac] ss:$12 sps:$4 sm:$0xff]   ;;  %v4206_v2 = vld [vmem:[%s6247_s1 + $0xa8] ss:$12 sps:$4 sm:$0xff]   ;;  %v4212_v6 = vld [vmem:[%s6247_s1 + $0x90] ss:$12 sps:$4 sm:$0xff]  }
   0x2   :  { %v4204_v1 = vld [vmem:[%s6247_s1 + $0x22c] ss:$12 sps:$4 sm:$0xff]   ;;  %1398 = vmatprep.subr.bf16.mxu0 %v4202_v0  ;;  %v4207_v3 = vld [vmem:[%s6247_s1 + $0x228] ss:$12 sps:$4 sm:$0xff]   ;;  %v4213_v7 = vld [vmem:[%s6247_s1 + $0x210] ss:$12 sps:$4 sm:$0xff]  }
   0x3   :  { %1439 = vmatprep.subr.bf16.mxu1 %v4204_v1  ;;  %v4208_v4 = vld [vmem:[%s6247_s1 + $0x94] ss:$12 sps:$4 sm:$0xff]   ;;  %1399 = vmatpush1.bf16.msra.mxu0 %v4206_v2  ;;  %v4214_v8 = vld [vmem:[%s6247_s1 + $0x7c] ss:$12 sps:$4 sm:$0xff]   ;;  %v4218_v10 = vld [vmem:[%s6247_s1 + $0x78] ss:$12 sps:$4 sm:$0xff]  }
   0x4   :  { %1440 = vmatpush1.bf16.msra.mxu1 %v4207_v3  ;;  %v4210_v5 = vld [vmem:[%s6247_s1 + $0x214] ss:$12 sps:$4 sm:$0xff]   ;;  %1400 = vmatprep.subr.bf16.mxu0 %v4208_v4  ;;  %v4216_v9 = vld [vmem:[%s6247_s1 + $0x1fc] ss:$12 sps:$4 sm:$0xff]   ;;  %v4219_v11 = vld [vmem:[%s6247_s1 + $0x1f8] ss:$12 sps:$4 sm:$0xff]  }
   0x5   :  { %1441 = vmatprep.subr.bf16.mxu1 %v4210_v5  ;;  %v4220_v12 = vld [vmem:[%s6247_s1 + $0x64] ss:$12 sps:$4 sm:$0xff]   ;;  %v4224_v14 = vld [vmem:[%s6247_s1 + $0x60] ss:$12 sps:$4 sm:$0xff]   ;;  %v4230_v18 = vld [vmem:[%s6247_s1 + $0x48] ss:$12 sps:$4 sm:$0xff]  }
   0x6   :  { %v4222_v13 = vld [vmem:[%s6247_s1 + $0x1e4] ss:$12 sps:$4 sm:$0xff]   ;;  %v4225_v15 = vld [vmem:[%s6247_s1 + $0x1e0] ss:$12 sps:$4 sm:$0xff]   ;;  %v4231_v19 = vld [vmem:[%s6247_s1 + $0x1c8] ss:$12 sps:$4 sm:$0xff]  }
   0x7   :  { %1401 = vmatpush1.bf16.msra.mxu0 %v4212_v6  ;;  %v4226_v16 = vld [vmem:[%s6247_s1 + $0x4c] ss:$12 sps:$4 sm:$0xff]   ;;  %v4232_v20 = vld [vmem:[%s6247_s1 + $0x34] ss:$12 sps:$4 sm:$0xff]   ;;  %v4236_v22 = vld [vmem:[%s6247_s1 + $0x30] ss:$12 sps:$4 sm:$0xff]  }
   0x8   :  { %1442 = vmatpush1.bf16.msra.mxu1 %v4213_v7  ;;  %1402 = vmatprep.subr.bf16.mxu0 %v4214_v8  ;;  %v4228_v17 = vld [vmem:[%s6247_s1 + $0x1cc] ss:$12 sps:$4 sm:$0xff]   ;;  %v4234_v21 = vld [vmem:[%s6247_s1 + $0x1b4] ss:$12 sps:$4 sm:$0xff]   ;;  %v4237_v23 = vld [vmem:[%s6247_s1 + $0x1b0] ss:$12 sps:$4 sm:$0xff]  }
   0x9   :  { %1443 = vmatprep.subr.bf16.mxu1 %v4216_v9  ;;  %v4238_v24 = vld [vmem:[%s6247_s1 + $0x1c] ss:$12 sps:$4 sm:$0xff]   ;;  %v4242_v26 = vld [vmem:[%s6247_s1 + $0x18] ss:$12 sps:$4 sm:$0xff]   ;;  %v4248_v30 = vld [vmem:[%s6247_s1] ss:$12 sps:$4 sm:$0xff]  }
   0xa   :  { %v4240_v25 = vld [vmem:[%s6247_s1 + $0x19c] ss:$12 sps:$4 sm:$0xff]   ;;  %v4243_v27 = vld [vmem:[%s6247_s1 + $0x198] ss:$12 sps:$4 sm:$0xff]   ;;  %v4249_v31 = vld [vmem:[%s6247_s1 + $0x180] ss:$12 sps:$4 sm:$0xff]  }
   0xb   :  { %1403 = vmatpush1.bf16.msra.mxu0 %v4218_v10  ;;  %v4244_v28 = vld [vmem:[%s6247_s1 + $0x4] ss:$12 sps:$4 sm:$0xff]   ;;  %v4250_v32 = vld [vmem:[%s6247_s1 + $0x16c] ss:$12 sps:$4 sm:$0xff]   ;;  %v4254_v34 = vld [vmem:[%s6247_s1 + $0x168] ss:$12 sps:$4 sm:$0xff]  }
   0xc   :  { %1444 = vmatpush1.bf16.msra.mxu1 %v4219_v11  ;;  %1404 = vmatprep.subr.bf16.mxu0 %v4220_v12  ;;  %v4246_v29 = vld [vmem:[%s6247_s1 + $0x184] ss:$12 sps:$4 sm:$0xff]   ;;  %v4252_v33 = vld [vmem:[%s6247_s1 + $0x2ec] ss:$12 sps:$4 sm:$0xff]   ;;  %v4255_v35 = vld [vmem:[%s6247_s1 + $0x2e8] ss:$12 sps:$4 sm:$0xff]  }
   0xd   :  { %1445 = vmatprep.subr.bf16.mxu1 %v4222_v13  ;;  %v4256_v36 = vld [vmem:[%s6247_s1 + $0x154] ss:$12 sps:$4 sm:$0xff]   ;;  %v4260_v38 = vld [vmem:[%s6247_s1 + $0x150] ss:$12 sps:$4 sm:$0xff]   ;;  %v4266_v42 = vld [vmem:[%s6247_s1 + $0x138] ss:$12 sps:$4 sm:$0xff]  }
   0xe   :  { %v4258_v37 = vld [vmem:[%s6247_s1 + $0x2d4] ss:$12 sps:$4 sm:$0xff]   ;;  %v4261_v39 = vld [vmem:[%s6247_s1 + $0x2d0] ss:$12 sps:$4 sm:$0xff]   ;;  %v4267_v43 = vld [vmem:[%s6247_s1 + $0x2b8] ss:$12 sps:$4 sm:$0xff]  }
   0xf   :  { %1405 = vmatpush1.bf16.msra.mxu0 %v4224_v14  ;;  %v4262_v40 = vld [vmem:[%s6247_s1 + $0x13c] ss:$12 sps:$4 sm:$0xff]   ;;  %v4268_v44 = vld [vmem:[%s6247_s1 + $0x124] ss:$12 sps:$4 sm:$0xff]   ;;  %v4272_v49 = vld [vmem:[%s6247_s1 + $0x120] ss:$12 sps:$4 sm:$0xff]  }
  0x10   :  { %1446 = vmatpush1.bf16.msra.mxu1 %v4225_v15  ;;  %1406 = vmatprep.subr.bf16.mxu0 %v4226_v16  ;;  %v4264_v41 = vld [vmem:[%s6247_s1 + $0x2bc] ss:$12 sps:$4 sm:$0xff]   ;;  %v4270_v45 = vld [vmem:[%s6247_s1 + $0x2a4] ss:$12 sps:$4 sm:$0xff]   ;;  %v4273_v50 = vld [vmem:[%s6247_s1 + $0x2a0] ss:$12 sps:$4 sm:$0xff]  }
  0x11   :  { %1447 = vmatprep.subr.bf16.mxu1 %v4228_v17  ;;  %v21_v46 = vld [vmem:[%s6248_s0] sm:$0xff]  ;;  %v22_v48 = vld [vmem:[%s6248_s0 + $0x8] sm:$0xff]  ;;  %v4284_v58 = vld [vmem:[%s6247_s1 + $0xf0] ss:$12 sps:$4 sm:$0xff]  }
  0x12   :  { %v4961_v47 = vcombine.high %v21_v46, %v21_v46  ;;  %v4972_v51 = vcombine.high %v22_v48, %v22_v48  ;;  %v4274_v52 = vld [vmem:[%s6247_s1 + $0x10c] ss:$12 sps:$4 sm:$0xff]   ;;  %v4278_v54 = vld [vmem:[%s6247_s1 + $0x108] ss:$12 sps:$4 sm:$0xff]   ;;  %v4285_v59 = vld [vmem:[%s6247_s1 + $0x270] ss:$12 sps:$4 sm:$0xff]   ;;  %v5030_v6 = vcombine.low %v21_v46, %v21_v46  ;;  %v5032_v7 = vcombine.low %v22_v48, %v22_v48 }
  0x13   :  { %1407 = vmatpush1.bf16.msra.mxu0 %v4230_v18  ;;  %v4276_v53 = vld [vmem:[%s6247_s1 + $0x28c] ss:$12 sps:$4 sm:$0xff]   ;;  %v4279_v55 = vld [vmem:[%s6247_s1 + $0x288] ss:$12 sps:$4 sm:$0xff]   ;;  %v4292_v0 = vld [vmem:[%s6247_s1 + $0xc4] ss:$12 sps:$4 sm:$0xff]  }
  0x14   :  { %1448 = vmatpush1.bf16.msra.mxu1 %v4231_v19  ;;  %1408 = vmatprep.subr.bf16.mxu0 %v4232_v20  ;;  %v4280_v56 = vld [vmem:[%s6247_s1 + $0xf4] ss:$12 sps:$4 sm:$0xff]   ;;  %v4286_v60 = vld [vmem:[%s6247_s1 + $0xdc] ss:$12 sps:$4 sm:$0xff]   ;;  %v4290_v62 = vld [vmem:[%s6247_s1 + $0xd8] ss:$12 sps:$4 sm:$0xff]  }
  0x15   :  { %1449 = vmatprep.subr.bf16.mxu1 %v4234_v21  ;;  %1430 = vmatprep.mubr.bf16.mxu0 %v4961_v47  ;;  %v4282_v57 = vld [vmem:[%s6247_s1 + $0x274] ss:$12 sps:$4 sm:$0xff]   ;;  %v4288_v61 = vld [vmem:[%s6247_s1 + $0x25c] ss:$12 sps:$4 sm:$0xff]   ;;  %v4291_v63 = vld [vmem:[%s6247_s1 + $0x258] ss:$12 sps:$4 sm:$0xff]  }
  0x16   :  { %1471 = vmatprep.mubr.bf16.mxu1 %v4972_v51  ;;  %v4294_v1 = vld [vmem:[%s6247_s1 + $0x244] ss:$12 sps:$4 sm:$0xff]   ;;  %v4296_v2 = vld [vmem:[%s6247_s1 + $0xc0] ss:$12 sps:$4 sm:$0xff]   ;;  %v4302_v8 = vld [vmem:[%s6247_s1 + $0x3a8] ss:$12 sps:$4 sm:$0xff]  }
  0x17   :  { %1409 = vmatpush1.bf16.msra.mxu0 %v4236_v22  ;;  %v4297_v3 = vld [vmem:[%s6247_s1 + $0x240] ss:$12 sps:$4 sm:$0xff]   ;;  %v4305_v9 = vld [vmem:[%s6247_s1 + $0x528] ss:$12 sps:$4 sm:$0xff]   ;;  %v4308_v12 = vld [vmem:[%s6247_s1 + $0x390] ss:$12 sps:$4 sm:$0xff]  }
  0x18   :  { %1450 = vmatpush1.bf16.msra.mxu1 %v4237_v23  ;;  %1410 = vmatprep.subr.bf16.mxu0 %v4238_v24  ;;  %v4304_v4 = vld [vmem:[%s6247_s1 + $0x3ac] ss:$12 sps:$4 sm:$0xff]   ;;  %v4310_v10 = vld [vmem:[%s6247_s1 + $0x394] ss:$12 sps:$4 sm:$0xff]   ;;  %v4311_v13 = vld [vmem:[%s6247_s1 + $0x510] ss:$12 sps:$4 sm:$0xff]  }
  0x19   :  { %1451 = vmatprep.subr.bf16.mxu1 %v4240_v25  ;;  %v4307_v5 = vld [vmem:[%s6247_s1 + $0x52c] ss:$12 sps:$4 sm:$0xff]   ;;  %v4313_v11 = vld [vmem:[%s6247_s1 + $0x514] ss:$12 sps:$4 sm:$0xff]   ;;  %v4316_v14 = vld [vmem:[%s6247_s1 + $0x37c] ss:$12 sps:$4 sm:$0xff]  }
  0x1a   :  { %v4319_v15 = vld [vmem:[%s6247_s1 + $0x4fc] ss:$12 sps:$4 sm:$0xff]   ;;  %v4314_v16 = vld [vmem:[%s6247_s1 + $0x378] ss:$12 sps:$4 sm:$0xff]   ;;  %v4320_v20 = vld [vmem:[%s6247_s1 + $0x360] ss:$12 sps:$4 sm:$0xff]  }
  0x1b   :  { %1411 = vmatpush1.bf16.msra.mxu0 %v4242_v26  ;;  %v4317_v17 = vld [vmem:[%s6247_s1 + $0x4f8] ss:$12 sps:$4 sm:$0xff]   ;;  %v4323_v21 = vld [vmem:[%s6247_s1 + $0x4e0] ss:$12 sps:$4 sm:$0xff]   ;;  %v4326_v24 = vld [vmem:[%s6247_s1 + $0x348] ss:$12 sps:$4 sm:$0xff]  }
  0x1c   :  { %1452 = vmatpush1.bf16.msra.mxu1 %v4243_v27  ;;  %1412 = vmatprep.subr.bf16.mxu0 %v4244_v28  ;;  %v4322_v18 = vld [vmem:[%s6247_s1 + $0x364] ss:$12 sps:$4 sm:$0xff]   ;;  %v4328_v22 = vld [vmem:[%s6247_s1 + $0x34c] ss:$12 sps:$4 sm:$0xff]   ;;  %v4329_v25 = vld [vmem:[%s6247_s1 + $0x4c8] ss:$12 sps:$4 sm:$0xff]  }
  0x1d   :  { %1453 = vmatprep.subr.bf16.mxu1 %v4246_v29  ;;  %v4325_v19 = vld [vmem:[%s6247_s1 + $0x4e4] ss:$12 sps:$4 sm:$0xff]   ;;  %v4331_v23 = vld [vmem:[%s6247_s1 + $0x4cc] ss:$12 sps:$4 sm:$0xff]   ;;  %v4334_v26 = vld [vmem:[%s6247_s1 + $0x334] ss:$12 sps:$4 sm:$0xff]  }
  0x1e   :  { %v4337_v27 = vld [vmem:[%s6247_s1 + $0x4b4] ss:$12 sps:$4 sm:$0xff]   ;;  %v4332_v28 = vld [vmem:[%s6247_s1 + $0x330] ss:$12 sps:$4 sm:$0xff]  }
  0x1f   :  { %1413 = vmatpush1.bf16.msra.mxu0 %v4248_v30  ;;  %v4335_v29 = vld [vmem:[%s6247_s1 + $0x4b0] ss:$12 sps:$4 sm:$0xff]   ;;  %v4358_v46 = vld [vmem:[%s6247_s1 + $0x454] ss:$12 sps:$4 sm:$0xff]  }
  0x20   :  { %1454 = vmatpush1.bf16.msra.mxu1 %v4249_v31  ;;  %1414 = vmatprep.subr.bf16.mxu0 %v4250_v32  ;;  %v4340_v30 = vld [vmem:[%s6247_s1 + $0x31c] ss:$12 sps:$4 sm:$0xff]   ;;  %v5111_v32 = vld [vmem:[%s6248_s0 + $0x10] sm:$0xff] }
  0x21   :  { %1455 = vmatprep.subr.bf16.mxu1 %v4252_v33  ;;  %v4343_v31 = vld [vmem:[%s6247_s1 + $0x49c] ss:$12 sps:$4 sm:$0xff]   ;;  %v4361_v48 = vld [vmem:[%s6247_s1 + $0x5d4] ss:$12 sps:$4 sm:$0xff]  }
  0x22   :  { %v5116_v33 = vld [vmem:[%s6248_s0 + $0x18] sm:$0xff] }
  0x23   :  { %1415 = vmatpush2.bf16.msra.mxu0 %v4254_v34  ;;  %v4338_v34 = vld [vmem:[%s6247_s1 + $0x318] ss:$12 sps:$4 sm:$0xff]  }
  0x24   :  { %1456 = vmatpush2.bf16.msra.mxu1 %v4255_v35  ;;  %1416 = vmatprep.subr.bf16.mxu0 %v4256_v36  ;;  %v4341_v35 = vld [vmem:[%s6247_s1 + $0x498] ss:$12 sps:$4 sm:$0xff]   ;;  %v5126_v36 = vcombine.high %v5111_v32, %v5111_v32 }
  0x25   :  { %1457 = vmatprep.subr.bf16.mxu1 %v4258_v37  ;;  %v5130_v37 = vcombine.high %v5116_v33, %v5116_v33 }
  0x27   :  { %1417 = vmatpush2.bf16.msra.mxu0 %v4260_v38  ;;  %v4346_v38 = vld [vmem:[%s6247_s1 + $0x304] ss:$12 sps:$4 sm:$0xff]  }
  0x28   :  { %1458 = vmatpush2.bf16.msra.mxu1 %v4261_v39  ;;  %1418 = vmatprep.subr.bf16.mxu0 %v4262_v40  ;;  %v4349_v39 = vld [vmem:[%s6247_s1 + $0x484] ss:$12 sps:$4 sm:$0xff]   ;;  %v4344_v40 = vld [vmem:[%s6247_s1 + $0x300] ss:$12 sps:$4 sm:$0xff]  }
  0x29   :  { %1459 = vmatprep.subr.bf16.mxu1 %v4264_v41  ;;  %v4347_v41 = vld [vmem:[%s6247_s1 + $0x480] ss:$12 sps:$4 sm:$0xff]  }
  0x2b   :  { %1419 = vmatpush2.bf16.msra.mxu0 %v4266_v42  ;;  %v4352_v42 = vld [vmem:[%s6247_s1 + $0x46c] ss:$12 sps:$4 sm:$0xff]  }
  0x2c   :  { %1460 = vmatpush2.bf16.msra.mxu1 %v4267_v43  ;;  %1420 = vmatprep.subr.bf16.mxu0 %v4268_v44  ;;  %v4355_v43 = vld [vmem:[%s6247_s1 + $0x5ec] ss:$12 sps:$4 sm:$0xff]   ;;  %v4350_v44 = vld [vmem:[%s6247_s1 + $0x468] ss:$12 sps:$4 sm:$0xff]  }
  0x2d   :  { %1461 = vmatprep.subr.bf16.mxu1 %v4270_v45  ;;  %v4353_v45 = vld [vmem:[%s6247_s1 + $0x5e8] ss:$12 sps:$4 sm:$0xff]  }
  0x2f   :  { %1421 = vmatpush2.bf16.msra.mxu0 %v4272_v49  ;;  %v4356_v49 = vld [vmem:[%s6247_s1 + $0x450] ss:$12 sps:$4 sm:$0xff]  }
  0x30   :  { %1462 = vmatpush2.bf16.msra.mxu1 %v4273_v50  ;;  %1422 = vmatprep.subr.bf16.mxu0 %v4274_v52  ;;  %v4359_v50 = vld [vmem:[%s6247_s1 + $0x5d0] ss:$12 sps:$4 sm:$0xff]  }
  0x31   :  { %1463 = vmatprep.subr.bf16.mxu1 %v4276_v53  ;;  %v4364_v52 = vld [vmem:[%s6247_s1 + $0x43c] ss:$12 sps:$4 sm:$0xff]  }
  0x32   :  { %v4367_v53 = vld [vmem:[%s6247_s1 + $0x5bc] ss:$12 sps:$4 sm:$0xff]  }
  0x33   :  { %1423 = vmatpush2.bf16.msra.mxu0 %v4278_v54  ;;  %v4362_v54 = vld [vmem:[%s6247_s1 + $0x438] ss:$12 sps:$4 sm:$0xff]  }
  0x34   :  { %1464 = vmatpush2.bf16.msra.mxu1 %v4279_v55  ;;  %1424 = vmatprep.subr.bf16.mxu0 %v4280_v56  ;;  %v4365_v55 = vld [vmem:[%s6247_s1 + $0x5b8] ss:$12 sps:$4 sm:$0xff]  }
  0x35   :  { %1465 = vmatprep.subr.bf16.mxu1 %v4282_v57  ;;  %v4370_v56 = vld [vmem:[%s6247_s1 + $0x424] ss:$12 sps:$4 sm:$0xff]  }
  0x36   :  { %v4373_v57 = vld [vmem:[%s6247_s1 + $0x5a4] ss:$12 sps:$4 sm:$0xff]  }
  0x37   :  { %1425 = vmatpush2.bf16.msra.mxu0 %v4284_v58  ;;  %v4368_v58 = vld [vmem:[%s6247_s1 + $0x420] ss:$12 sps:$4 sm:$0xff]  }
  0x38   :  { %1466 = vmatpush2.bf16.msra.mxu1 %v4285_v59  ;;  %1426 = vmatprep.subr.bf16.mxu0 %v4286_v60  ;;  %v4371_v59 = vld [vmem:[%s6247_s1 + $0x5a0] ss:$12 sps:$4 sm:$0xff]  }
  0x39   :  { %1467 = vmatprep.subr.bf16.mxu1 %v4288_v61  ;;  %v4376_v60 = vld [vmem:[%s6247_s1 + $0x40c] ss:$12 sps:$4 sm:$0xff]  }
  0x3a   :  { %v4379_v61 = vld [vmem:[%s6247_s1 + $0x58c] ss:$12 sps:$4 sm:$0xff]  }
  0x3b   :  { %1427 = vmatpush2.bf16.msra.mxu0 %v4290_v62  ;;  %v4374_v62 = vld [vmem:[%s6247_s1 + $0x408] ss:$12 sps:$4 sm:$0xff]  }
  0x3c   :  { %1468 = vmatpush2.bf16.msra.mxu1 %v4291_v63  ;;  %1428 = vmatprep.subr.bf16.mxu0 %v4292_v0  ;;  %v4377_v63 = vld [vmem:[%s6247_s1 + $0x588] ss:$12 sps:$4 sm:$0xff]  }
  0x3d   :  { %1469 = vmatprep.subr.bf16.mxu1 %v4294_v1  ;;  %v4382_v0 = vld [vmem:[%s6247_s1 + $0x3f4] ss:$12 sps:$4 sm:$0xff]  }
  0x3e   :  { %v4385_v1 = vld [vmem:[%s6247_s1 + $0x574] ss:$12 sps:$4 sm:$0xff]  }
  0x3f   :  { %1429 = vmatpush2.bf16.msra.mxu0 %v4296_v2  ;;  %v4380_v2 = vld [vmem:[%s6247_s1 + $0x3f0] ss:$12 sps:$4 sm:$0xff]  }
  0x40   :  { %1470 = vmatpush2.bf16.msra.mxu1 %v4297_v3  ;;  %1480 = vmatprep.subr.bf16.mxu0 %v4304_v4  ;;  %v4383_v3 = vld [vmem:[%s6247_s1 + $0x570] ss:$12 sps:$4 sm:$0xff]  }
  0x41   :  { %1521 = vmatprep.subr.bf16.mxu1 %v4307_v5  ;;  %v4388_v4 = vld [vmem:[%s6247_s1 + $0x3dc] ss:$12 sps:$4 sm:$0xff]  }
  0x42   :  { %1431 = vmatmul.mubr.bf16.vlgmr.msra.gmra.mxu0 %v5030_v6  ;;  %v4391_v5 = vld [vmem:[%s6247_s1 + $0x55c] ss:$12 sps:$4 sm:$0xff]  }
  0x43   :  { %1472 = vmatmul.mubr.bf16.vlgmr.msra.gmra.mxu1 %v5032_v7  ;;  %1481 = vmatpush1.bf16.msra.mxu0 %v4302_v8  ;;  %v4386_v8 = vld [vmem:[%s6247_s1 + $0x3d8] ss:$12 sps:$4 sm:$0xff]  }
  0x44   :  { %1522 = vmatpush1.bf16.msra.mxu1 %v4305_v9  ;;  %1482 = vmatprep.subr.bf16.mxu0 %v4310_v10  ;;  %v4389_v9 = vld [vmem:[%s6247_s1 + $0x558] ss:$12 sps:$4 sm:$0xff]  }
  0x45   :  { %1523 = vmatprep.subr.bf16.mxu1 %v4313_v11  ;;  %1512 = vmatprep.mubr.bf16.mxu0 %v5126_v36  ;;  %v4394_v10 = vld [vmem:[%s6247_s1 + $0x3c4] ss:$12 sps:$4 sm:$0xff]  }
  0x46   :  { %1553 = vmatprep.mubr.bf16.mxu1 %v5130_v37  ;;  %v4397_v11 = vld [vmem:[%s6247_s1 + $0x544] ss:$12 sps:$4 sm:$0xff]  }
  0x47   :  { %1483 = vmatpush1.bf16.msra.mxu0 %v4308_v12  ;;  %v4392_v12 = vld [vmem:[%s6247_s1 + $0x3c0] ss:$12 sps:$4 sm:$0xff]  }
  0x48   :  { %1524 = vmatpush1.bf16.msra.mxu1 %v4311_v13  ;;  %1484 = vmatprep.subr.bf16.mxu0 %v4316_v14  ;;  %v4395_v13 = vld [vmem:[%s6247_s1 + $0x540] ss:$12 sps:$4 sm:$0xff]   ;;  %v4404_v14 = vld [vmem:[%s6247_s1 + $0x61c] ss:$12 sps:$4 sm:$0xff]  }
  0x49   :  { %1525 = vmatprep.subr.bf16.mxu1 %v4319_v15  ;;  %v4405_v15 = vld [vmem:[%s6247_s1 + $0x170] ss:$12 sps:$4 sm:$0xff]  }
  0x4b   :  { %1485 = vmatpush1.bf16.msra.mxu0 %v4314_v16  ;;  %v4402_v16 = vld [vmem:[%s6247_s1 + $0x618] ss:$12 sps:$4 sm:$0xff]  }
  0x4c   :  { %1526 = vmatpush1.bf16.msra.mxu1 %v4317_v17  ;;  %1486 = vmatprep.subr.bf16.mxu0 %v4322_v18  ;;  %v5253_v17 = vcombine.low %v5111_v32, %v5111_v32  ;;  %v5257_v18 = vcombine.low %v5116_v33, %v5116_v33  ;;  %v4420_v32 = vld [vmem:[%s6247_s1 + $0x218] ss:$12 sps:$4 sm:$0xff]   ;;  %v4421_v33 = vld [vmem:[%s6247_s1 + $0x110] ss:$12 sps:$4 sm:$0xff]  }
  0x4d   :  { %1527 = vmatprep.subr.bf16.mxu1 %v4325_v19  ;;  %v4406_v19 = vld [vmem:[%s6247_s1 + $0xb0] ss:$12 sps:$4 sm:$0xff]  }
  0x4f   :  { %1487 = vmatpush1.bf16.msra.mxu0 %v4320_v20  ;;  %v4409_v20 = vld [vmem:[%s6247_s1 + $0x604] ss:$12 sps:$4 sm:$0xff]  }
  0x50   :  { %1528 = vmatpush1.bf16.msra.mxu1 %v4323_v21  ;;  %1488 = vmatprep.subr.bf16.mxu0 %v4328_v22  ;;  %v4410_v21 = vld [vmem:[%s6247_s1 + $0x158] ss:$12 sps:$4 sm:$0xff]   ;;  %v4407_v22 = vld [vmem:[%s6247_s1 + $0x600] ss:$12 sps:$4 sm:$0xff]  }
  0x51   :  { %1529 = vmatprep.subr.bf16.mxu1 %v4331_v23  ;;  %v4411_v23 = vld [vmem:[%s6247_s1 + $0x98] ss:$12 sps:$4 sm:$0xff]  }
  0x53   :  { %1489 = vmatpush1.bf16.msra.mxu0 %v4326_v24  ;;  %v4413_v24 = vld [vmem:[%s6247_s1 + $0x140] ss:$12 sps:$4 sm:$0xff]  }
  0x54   :  { %1530 = vmatpush1.bf16.msra.mxu1 %v4329_v25  ;;  %1490 = vmatprep.subr.bf16.mxu0 %v4334_v26  ;;  %v5282_v25 = vld [vmem:[%s6248_s0 + $0x20] ss:$0 sps:$4 sm:$0xff]   ;;  %v4414_v26 = vld [vmem:[%s6247_s1 + $0x2f0] ss:$12 sps:$4 sm:$0xff]  }
  0x55   :  { %1531 = vmatprep.subr.bf16.mxu1 %v4337_v27  ;;  %v4787_v27 = vmov 0  }
  0x57   :  { %1491 = vmatpush1.bf16.msra.mxu0 %v4332_v28  ;;  %v4415_v28 = vld [vmem:[%s6247_s1 + $0x80] ss:$12 sps:$4 sm:$0xff]  }
  0x58   :  { %1532 = vmatpush1.bf16.msra.mxu1 %v4335_v29  ;;  %1492 = vmatprep.subr.bf16.mxu0 %v4340_v30  ;;  %v4416_v29 = vld [vmem:[%s6247_s1 + $0x230] ss:$12 sps:$4 sm:$0xff]   ;;  %v4417_v30 = vld [vmem:[%s6247_s1 + $0x128] ss:$12 sps:$4 sm:$0xff]  }
  0x59   :  { %1533 = vmatprep.subr.bf16.mxu1 %v4343_v31  ;;  %v4418_v31 = vld [vmem:[%s6247_s1 + $0x2d8] ss:$12 sps:$4 sm:$0xff]  }
  0x5b   :  { %1493 = vmatpush1.bf16.msra.mxu0 %v4338_v34  ;;  %v4422_v34 = vld [vmem:[%s6247_s1 + $0x2c0] ss:$12 sps:$4 sm:$0xff]  }
  0x5c   :  { %1534 = vmatpush1.bf16.msra.mxu1 %v4341_v35  ;;  %1494 = vmatprep.subr.bf16.mxu0 %v4346_v38  ;;  %v4423_v35 = vld [vmem:[%s6247_s1 + $0x50] ss:$12 sps:$4 sm:$0xff]   ;;  %v4424_v38 = vld [vmem:[%s6247_s1 + $0x200] ss:$12 sps:$4 sm:$0xff]  }
  0x5d   :  { %1535 = vmatprep.subr.bf16.mxu1 %v4349_v39  ;;  %v4425_v39 = vld [vmem:[%s6247_s1 + $0xf8] ss:$12 sps:$4 sm:$0xff]  }
  0x5f   :  { %1495 = vmatpush1.bf16.msra.mxu0 %v4344_v40  ;;  %v4426_v40 = vld [vmem:[%s6247_s1 + $0x2a8] ss:$12 sps:$4 sm:$0xff]  }
  0x60   :  { %1536 = vmatpush1.bf16.msra.mxu1 %v4347_v41  ;;  %1496 = vmatprep.subr.bf16.mxu0 %v4352_v42  ;;  %v4428_v41 = vld [vmem:[%s6247_s1 + $0x1e8] ss:$12 sps:$4 sm:$0xff]   ;;  %v4429_v42 = vld [vmem:[%s6247_s1 + $0xe0] ss:$12 sps:$4 sm:$0xff]  }
  0x61   :  { %1537 = vmatprep.subr.bf16.mxu1 %v4355_v43  ;;  %v4430_v43 = vld [vmem:[%s6247_s1 + $0x290] ss:$12 sps:$4 sm:$0xff]  }
  0x63   :  { %1497 = vmatpush2.bf16.msra.mxu0 %v4350_v44  ;;  %v4431_v44 = vld [vmem:[%s6247_s1 + $0x20] ss:$12 sps:$4 sm:$0xff]  }
  0x64   :  { %1538 = vmatpush2.bf16.msra.mxu1 %v4353_v45  ;;  %1498 = vmatprep.subr.bf16.mxu0 %v4358_v46  ;;  %v4432_v45 = vld [vmem:[%s6247_s1 + $0x1d0] ss:$12 sps:$4 sm:$0xff]   ;;  %v4433_v46 = vld [vmem:[%s6247_s1 + $0xc8] ss:$12 sps:$4 sm:$0xff]  }
  0x65   :  { %1539 = vmatprep.subr.bf16.mxu1 %v4361_v48  ;;  %v4434_v48 = vld [vmem:[%s6247_s1 + $0x278] ss:$12 sps:$4 sm:$0xff]  }
  0x67   :  { %1499 = vmatpush2.bf16.msra.mxu0 %v4356_v49  ;;  %v4435_v49 = vld [vmem:[%s6247_s1 + $0x8] ss:$12 sps:$4 sm:$0xff]  }
  0x68   :  { %1540 = vmatpush2.bf16.msra.mxu1 %v4359_v50  ;;  %1500 = vmatprep.subr.bf16.mxu0 %v4364_v52  ;;  %v4436_v50 = vld [vmem:[%s6247_s1 + $0x1b8] ss:$12 sps:$4 sm:$0xff]   ;;  %v4437_v52 = vld [vmem:[%s6247_s1 + $0x260] ss:$12 sps:$4 sm:$0xff]  }
  0x69   :  { %1541 = vmatprep.subr.bf16.mxu1 %v4367_v53  ;;  %v4438_v53 = vld [vmem:[%s6247_s1 + $0x470] ss:$12 sps:$4 sm:$0xff]  }
  0x6b   :  { %1501 = vmatpush2.bf16.msra.mxu0 %v4362_v54  ;;  %v4439_v54 = vld [vmem:[%s6247_s1 + $0x1a0] ss:$12 sps:$4 sm:$0xff]  }
  0x6c   :  { %1542 = vmatpush2.bf16.msra.mxu1 %v4365_v55  ;;  %1502 = vmatprep.subr.bf16.mxu0 %v4370_v56  ;;  %v4440_v55 = vld [vmem:[%s6247_s1 + $0x3b0] ss:$12 sps:$4 sm:$0xff]   ;;  %v4441_v56 = vld [vmem:[%s6247_s1 + $0x248] ss:$12 sps:$4 sm:$0xff]  }
  0x6d   :  { %1543 = vmatprep.subr.bf16.mxu1 %v4373_v57  ;;  %v4442_v57 = vld [vmem:[%s6247_s1 + $0x458] ss:$12 sps:$4 sm:$0xff]  }
  0x6f   :  { %1503 = vmatpush2.bf16.msra.mxu0 %v4368_v58  ;;  %v4443_v58 = vld [vmem:[%s6247_s1 + $0x188] ss:$12 sps:$4 sm:$0xff]  }
  0x70   :  { %1544 = vmatpush2.bf16.msra.mxu1 %v4371_v59  ;;  %1504 = vmatprep.subr.bf16.mxu0 %v4376_v60  ;;  %v4444_v59 = vld [vmem:[%s6247_s1 + $0x398] ss:$12 sps:$4 sm:$0xff]   ;;  %v4445_v60 = vld [vmem:[%s6247_s1 + $0x440] ss:$12 sps:$4 sm:$0xff]  }
  0x71   :  { %1545 = vmatprep.subr.bf16.mxu1 %v4379_v61  ;;  %v4447_v61 = vld [vmem:[%s6247_s1 + $0x380] ss:$12 sps:$4 sm:$0xff]  }
  0x73   :  { %1505 = vmatpush2.bf16.msra.mxu0 %v4374_v62  ;;  %v4448_v62 = vld [vmem:[%s6247_s1 + $0x530] ss:$12 sps:$4 sm:$0xff]  }
  0x74   :  { %1546 = vmatpush2.bf16.msra.mxu1 %v4377_v63  ;;  %1506 = vmatprep.subr.bf16.mxu0 %v4382_v0  ;;  %v4449_v63 = vld [vmem:[%s6247_s1 + $0x428] ss:$12 sps:$4 sm:$0xff]  }
  0x75   :  { %1547 = vmatprep.subr.bf16.mxu1 %v4385_v1  ;;  %v4451_v0 = vld [vmem:[%s6247_s1 + $0x368] ss:$12 sps:$4 sm:$0xff]   ;;  %v4452_v1 = vld [vmem:[%s6247_s1 + $0x518] ss:$12 sps:$4 sm:$0xff]  }
  0x77   :  { %1507 = vmatpush2.bf16.msra.mxu0 %v4380_v2  ;;  %v4453_v2 = vld [vmem:[%s6247_s1 + $0x410] ss:$12 sps:$4 sm:$0xff]  }
  0x78   :  { %1548 = vmatpush2.bf16.msra.mxu1 %v4383_v3  ;;  %1508 = vmatprep.subr.bf16.mxu0 %v4388_v4  ;;  %v4454_v3 = vld [vmem:[%s6247_s1 + $0x5c0] ss:$12 sps:$4 sm:$0xff]   ;;  %v4455_v4 = vld [vmem:[%s6247_s1 + $0x350] ss:$12 sps:$4 sm:$0xff]  }
  0x79   :  { %1549 = vmatprep.subr.bf16.mxu1 %v4391_v5  ;;  %v4457_v5 = vld [vmem:[%s6247_s1 + $0x3f8] ss:$12 sps:$4 sm:$0xff]  }
  0x7b   :  { %1509 = vmatpush2.bf16.msra.mxu0 %v4386_v8  ;;  %v4458_v8 = vld [vmem:[%s6247_s1 + $0x5a8] ss:$12 sps:$4 sm:$0xff]  }
  0x7c   :  { %1550 = vmatpush2.bf16.msra.mxu1 %v4389_v9  ;;  %1510 = vmatprep.subr.bf16.mxu0 %v4394_v10  ;;  %v4459_v9 = vld [vmem:[%s6247_s1 + $0x338] ss:$12 sps:$4 sm:$0xff]   ;;  %v4461_v10 = vld [vmem:[%s6247_s1 + $0x3e0] ss:$12 sps:$4 sm:$0xff]  }
  0x7d   :  { %1551 = vmatprep.subr.bf16.mxu1 %v4397_v11  ;;  %v4462_v11 = vld [vmem:[%s6247_s1 + $0x590] ss:$12 sps:$4 sm:$0xff]  }
  0x7f   :  { %1511 = vmatpush2.bf16.msra.mxu0 %v4392_v12  ;;  %v4463_v12 = vld [vmem:[%s6247_s1 + $0x320] ss:$12 sps:$4 sm:$0xff]  }
  0x80   :  { %1552 = vmatpush2.bf16.msra.mxu1 %v4395_v13  ;;  %1574 = vmatprep.subr.bf16.mxu0 %v4404_v14  ;;  %v4464_v13 = vld [vmem:[%s6247_s1 + $0x4d0] ss:$12 sps:$4 sm:$0xff]   ;;  %v4465_v14 = vld [vmem:[%s6247_s1 + $0x3c8] ss:$12 sps:$4 sm:$0xff]  }
  0x81   :  { %4049 = vmatprep.subr.bf16.mxu1 %v4405_v15  ;;  %v4466_v15 = vld [vmem:[%s6247_s1 + $0x578] ss:$12 sps:$4 sm:$0xff]  }
  0x82   :  { %1513 = vmatmul.mubr.bf16.vlgmr.msra.gmra.mxu0 %v5253_v17 }
  0x83   :  { %1554 = vmatmul.mubr.bf16.vlgmr.msra.gmra.mxu1 %v5257_v18  ;;  %1575 = vmatpush1.bf16.msra.mxu0 %v4402_v16  ;;  %v4467_v16 = vld [vmem:[%s6247_s1 + $0x308] ss:$12 sps:$4 sm:$0xff]  }
  0x84   :  { %4050 = vmatpush3.bf16.msra.mxu1 %v4406_v19  ;;  %1576 = vmatprep.subr.bf16.mxu0 %v4409_v20  ;;  %v4468_v19 = vld [vmem:[%s6247_s1 + $0x4b8] ss:$12 sps:$4 sm:$0xff]   ;;  %v4469_v20 = vld [vmem:[%s6247_s1 + $0x560] ss:$12 sps:$4 sm:$0xff]  }
  0x85   :  { %4051 = vmatprep.subr.bf16.mxu1 %v4410_v21  ;;  %1594 = vmatprep.mubr.bf16.mxu0 %v4787_v27  ;;  %v4470_v21 = vld [vmem:[%s6247_s1 + $0x4a0] ss:$12 sps:$4 sm:$0xff]  }
  0x86   :  { %1635 = vmatprep.mubr.bf16.mxu1 %v4961_v47  ;;  %v4419_v47 = vld [vmem:[%s6247_s1 + $0x68] ss:$12 sps:$4 sm:$0xff]  }
  0x87   :  { %1577 = vmatpush1.bf16.msra.mxu0 %v4407_v22  ;;  %v4471_v22 = vld [vmem:[%s6247_s1 + $0x620] ss:$12 sps:$4 sm:$0xff]  }
  0x88   :  { %4052 = vmatpush3.bf16.msra.mxu1 %v4411_v23  ;;  %4071 = vmatprep.subr.bf16.mxu0 %v4414_v26  ;;  %v4472_v23 = vld [vmem:[%s6247_s1 + $0x548] ss:$12 sps:$4 sm:$0xff]  }
  0x89   :  { %4053 = vmatprep.subr.bf16.mxu1 %v4413_v24  ;;  %v4788_v24 = vmov 0.0   ;;  %v4473_v26 = vld [vmem:[%s6247_s1 + $0x488] ss:$12 sps:$4 sm:$0xff]  }
  0x8a   :  { %3830 = vmatmul.mubr.msk.bf16.vlgmr.msra.gmra.mxu0 %vm1394_vm0, %v5282_v25 }
  0x8b   :  { %4072 = vmatpush3.bf16.msra.mxu0 %v4416_v29  ;;  %1675 = vmatprep.mubr.bf16.mxu0 %v4972_v51  ;;  %v4427_v51 = vld [vmem:[%s6247_s1 + $0x38] ss:$12 sps:$4 sm:$0xff]   ;;  %v4477_v29 = vld [vmem:[%s6249_s3 + $0x1fc] ss:$36 sps:$4 sm:$0xff]  }
  0x8c   :  { %4054 = vmatpush3.bf16.msra.mxu1 %v4415_v28  ;;  %4073 = vmatprep.subr.bf16.mxu0 %v4418_v31  ;;  %v4474_v28 = vld [vmem:[%s6247_s1 + $0x608] ss:$12 sps:$4 sm:$0xff]  }
  0x8d   :  { %4055 = vmatprep.subr.bf16.mxu1 %v4417_v30  ;;  %v4480_v30 = vld [vmem:[%s6249_s3 + $0x1b4] ss:$36 sps:$4 sm:$0xff]  }
  0x8e   :  { %v4478_v31 = vld [vmem:[%s6249_s3 + $0x1b0] ss:$36 sps:$4 sm:$0xff]  }
  0x8f   :  { %4074 = vmatpush3.bf16.msra.mxu0 %v4420_v32  ;;  %v4481_v32 = vld [vmem:[%s6249_s3 + $0x168] ss:$36 sps:$4 sm:$0xff]  }
  0x90   :  { %4056 = vmatpush3.bf16.msra.mxu1 %v4419_v47  ;;  %4075 = vmatprep.subr.bf16.mxu0 %v4422_v34  ;;  %v4483_v47 = vld [vmem:[%s6249_s3 + $0x16c] ss:$36 sps:$4 sm:$0xff]   ;;  %v4487_v34 = vld [vmem:[%s6249_s3 + $0xd8] ss:$36 sps:$4 sm:$0xff]  }
  0x91   :  { %4057 = vmatprep.subr.bf16.mxu1 %v4421_v33  ;;  %v4489_v33 = vld [vmem:[%s6249_s3 + $0xdc] ss:$36 sps:$4 sm:$0xff]  }
  0x93   :  { %4076 = vmatpush3.bf16.msra.mxu0 %v4424_v38  ;;  %v4490_v38 = vld [vmem:[%s6249_s3 + $0x90] ss:$36 sps:$4 sm:$0xff]  }
  0x94   :  { %4058 = vmatpush3.bf16.msra.mxu1 %v4423_v35  ;;  %4077 = vmatprep.subr.bf16.mxu0 %v4426_v40  ;;  %v4492_v35 = vld [vmem:[%s6249_s3 + $0x94] ss:$36 sps:$4 sm:$0xff]   ;;  %v4493_v40 = vld [vmem:[%s6249_s3 + $0x48] ss:$36 sps:$4 sm:$0xff]  }
  0x95   :  { %4059 = vmatprep.subr.bf16.mxu1 %v4425_v39  ;;  %v4495_v39 = vld [vmem:[%s6249_s3 + $0x4c] ss:$36 sps:$4 sm:$0xff]  }
  0x97   :  { %4078 = vmatpush3.bf16.msra.mxu0 %v4428_v41  ;;  %v4496_v41 = vld [vmem:[%s6249_s3] ss:$36 sps:$4 sm:$0xff]  }
  0x98   :  { %4060 = vmatpush3.bf16.msra.mxu1 %v4427_v51  ;;  %4079 = vmatprep.subr.bf16.mxu0 %v4430_v43  ;;  %v4498_v51 = vld [vmem:[%s6249_s3 + $0x4] ss:$36 sps:$4 sm:$0xff]   ;;  %v4499_v43 = vld [vmem:[%s6249_s3 + $0x438] ss:$36 sps:$4 sm:$0xff]  }
  0x99   :  { %4061 = vmatprep.subr.bf16.mxu1 %v4429_v42  ;;  %v4501_v42 = vld [vmem:[%s6249_s3 + $0x43c] ss:$36 sps:$4 sm:$0xff]  }
  0x9b   :  { %4080 = vmatpush3.bf16.msra.mxu0 %v4432_v45  ;;  %v4502_v45 = vld [vmem:[%s6249_s3 + $0x3f0] ss:$36 sps:$4 sm:$0xff]  }
  0x9c   :  { %4062 = vmatpush3.bf16.msra.mxu1 %v4431_v44  ;;  %4081 = vmatprep.subr.bf16.mxu0 %v4434_v48  ;;  %v4504_v44 = vld [vmem:[%s6249_s3 + $0x3f4] ss:$36 sps:$4 sm:$0xff]   ;;  %v4505_v48 = vld [vmem:[%s6249_s3 + $0x3a8] ss:$36 sps:$4 sm:$0xff]  }
  0x9d   :  { %4063 = vmatprep.subr.bf16.mxu1 %v4433_v46  ;;  %v4507_v46 = vld [vmem:[%s6249_s3 + $0x3ac] ss:$36 sps:$4 sm:$0xff]  }
  0x9f   :  { %4082 = vmatpush3.bf16.msra.mxu0 %v4436_v50  ;;  %v4510_v50 = vld [vmem:[%s6249_s3 + $0x364] ss:$36 sps:$4 sm:$0xff]  }
  0xa0   :  { %4064 = vmatpush3.bf16.msra.mxu1 %v4435_v49  ;;  %4083 = vmatprep.subr.bf16.mxu0 %v4437_v52  ;;  %v292_v49 = vlaneseq  ;;  %v4523_v52 = vld [vmem:[%s6249_s3 + $0x678] ss:$36 sps:$4 sm:$0xff]  }
  0xa1   :  { %4093 = vmatprep.subr.bf16.mxu1 %v4438_v53  ;;  %v4525_v53 = vld [vmem:[%s6249_s3 + $0x67c] ss:$36 sps:$4 sm:$0xff]  }
  0xa3   :  { %1636 = vmatmul.mubr.bf16.vlgmr.msra.gmra.mxu1 %v5030_v6  ;;  %4084 = vmatpush3.bf16.msra.mxu0 %v4439_v54  ;;  %v4446_v6 = vld [vmem:[%s6247_s1 + $0x5f0] ss:$12 sps:$4 sm:$0xff]   ;;  %v4531_v54 = vld [vmem:[%s6249_s3 + $0x634] ss:$36 sps:$4 sm:$0xff]  }
  0xa4   :  { %4094 = vmatpush3.bf16.msra.mxu1 %v4440_v55  ;;  %4085 = vmatprep.subr.bf16.mxu0 %v4441_v56  ;;  %v4508_v55 = vld [vmem:[%s6249_s3 + $0x360] ss:$36 sps:$4 sm:$0xff]  }
  0xa5   :  { %4095 = vmatprep.subr.bf16.mxu1 %v4442_v57  ;;  %1715 = vmatprep.mubr.bf16.mxu1 %v5126_v36  ;;  %v4450_v36 = vld [vmem:[%s6247_s1 + $0x5d8] ss:$12 sps:$4 sm:$0xff]   ;;  %v4513_v56 = vld [vmem:[%s6249_s3 + $0x31c] ss:$36 sps:$4 sm:$0xff]   ;;  %v4529_v57 = vld [vmem:[%s6249_s3 + $0x630] ss:$36 sps:$4 sm:$0xff]  }
  0xa7   :  { %4086 = vmatpush3.bf16.msra.mxu0 %v4443_v58  ;;  %v4537_v58 = vld [vmem:[%s6249_s3 + $0x5ec] ss:$36 sps:$4 sm:$0xff]  }
  0xa8   :  { %4096 = vmatpush3.bf16.msra.mxu1 %v4444_v59  ;;  %4115 = vmatprep.subr.bf16.mxu0 %v4446_v6  ;;  %v5575_v59 = vshrl.u32 %v292_v49, 7  ;;  %v4535_v6 = vld [vmem:[%s6249_s3 + $0x5e8] ss:$36 sps:$4 sm:$0xff]  }
  0xa9   :  { %4097 = vmatprep.subr.bf16.mxu1 %v4445_v60  ;;  %v4511_v60 = vld [vmem:[%s6249_s3 + $0x318] ss:$36 sps:$4 sm:$0xff]  }
  0xaa   :  { %1676 = vmatmul.mubr.bf16.vlgmr.msra.gmra.mxu0 %v5032_v7  ;;  %v4456_v7 = vld [vmem:[%s6247_s1 + $0x500] ss:$12 sps:$4 sm:$0xff]  }
  0xab   :  { %4116 = vmatpush3.bf16.msra.mxu0 %v4448_v62  ;;  %1755 = vmatprep.mubr.bf16.mxu0 %v5130_v37  ;;  %v4460_v37 = vld [vmem:[%s6247_s1 + $0x4e8] ss:$12 sps:$4 sm:$0xff]   ;;  %v294_v62 = vsub.s32 0, %v5575_v59 }
  0xac   :  { %4098 = vmatpush3.bf16.msra.mxu1 %v4447_v61  ;;  %4117 = vmatprep.subr.bf16.mxu0 %v4450_v36  ;;  %v4516_v61 = vld [vmem:[%s6249_s3 + $0x2d4] ss:$36 sps:$4 sm:$0xff]   ;;  %v5593_v36 = vld [vmem:[%s6250_s2] sm:$0x7] }
  0xad   :  { %4099 = vmatprep.subr.bf16.mxu1 %v4449_v63  ;;  %v4514_v63 = vld [vmem:[%s6249_s3 + $0x2d0] ss:$36 sps:$4 sm:$0xff]  }
  0xaf   :  { %4118 = vmatpush3.bf16.msra.mxu0 %v4452_v1  ;;  %v298_v1 = vsub.s32 1, %v5575_v59 }
  0xb0   :  { %4100 = vmatpush3.bf16.msra.mxu1 %v4451_v0  ;;  %4119 = vmatprep.subr.bf16.mxu0 %v4454_v3  ;;  %v4519_v0 = vld [vmem:[%s6249_s3 + $0x28c] ss:$36 sps:$4 sm:$0xff]  }
  0xb1   :  { %4101 = vmatprep.subr.bf16.mxu1 %v4453_v2  ;;  %v295_v2 = vrot.slane %v5593_v36, %v294_v62  ;;  %v4517_v3 = vld [vmem:[%s6249_s3 + $0x288] ss:$36 sps:$4 sm:$0xff]  }
  0xb3   :  { %4120 = vmatpush3.bf16.msra.mxu0 %v4456_v7  ;;  %v4543_v7 = vld [vmem:[%s6249_s3 + $0x5a4] ss:$36 sps:$4 sm:$0xff]  }
  0xb4   :  { %4102 = vmatpush3.bf16.msra.mxu1 %v4455_v4  ;;  %4121 = vmatprep.subr.bf16.mxu0 %v4458_v8  ;;  %v4522_v4 = vld [vmem:[%s6249_s3 + $0x244] ss:$36 sps:$4 sm:$0xff]  }
  0xb5   :  { %4103 = vmatprep.subr.bf16.mxu1 %v4457_v5  ;;  %v299_v5 = vrot.slane %v5593_v36, %v298_v1  ;;  %v4541_v8 = vld [vmem:[%s6249_s3 + $0x5a0] ss:$36 sps:$4 sm:$0xff]  }
  0xb7   :  { %4122 = vmatpush3.bf16.msra.mxu0 %v4460_v37 }
  0xb8   :  { %4104 = vmatpush3.bf16.msra.mxu1 %v4459_v9  ;;  %4123 = vmatprep.subr.bf16.mxu0 %v4462_v11  ;;  %v4520_v11 = vld [vmem:[%s6249_s3 + $0x240] ss:$36 sps:$4 sm:$0xff]  }
  0xb9   :  { %4105 = vmatprep.subr.bf16.mxu1 %v4461_v10 }
  0xbb   :  { %4124 = vmatpush3.bf16.msra.mxu0 %v4464_v13 }
  0xbc   :  { %4106 = vmatpush3.bf16.msra.mxu1 %v4463_v12  ;;  %4125 = vmatprep.subr.bf16.mxu0 %v4466_v15  ;;  %v4549_v15 = vld [vmem:[%s6249_s3 + $0x55c] ss:$36 sps:$4 sm:$0xff]  }
  0xbd   :  { %4107 = vmatprep.subr.bf16.mxu1 %v4465_v14  ;;  %v4528_v14 = vld [vmem:[%s6249_s3 + $0x684] ss:$36 sps:$4 sm:$0xff]  }
  0xbf   :  { %4126 = vmatpush3.bf16.msra.mxu0 %v4468_v19 }
  0xc0   :  { %4108 = vmatpush3.bf16.msra.mxu1 %v4467_v16  ;;  %4127 = vmatprep.subr.bf16.mxu0 %v4469_v20  ;;  %v4547_v20 = vld [vmem:[%s6249_s3 + $0x558] ss:$36 sps:$4 sm:$0xff]  }
  0xc1   :  { %4171 = vmatprep.subr.bf16.mxu1 %v4788_v24 }
  0xc3   :  { %1716 = vmatmul.mubr.bf16.vlgmr.msra.gmra.mxu1 %v5253_v17  ;;  %4128 = vmatpush3.bf16.msra.mxu0 %v4470_v21  ;;  %v4475_v17 = vld [vmem:[%s6249_s3 + $0x1f8] ss:$36 sps:$4 sm:$0xff]  }
  0xc4   :  { %4172 = vmatpush3.bf16.msra.mxu1 %v4471_v22  ;;  %4129 = vmatprep.subr.bf16.mxu0 %v4472_v23 }
  0xc5   :  { %4173 = vmatprep.subr.bf16.mxu1 %v4788_v24  ;;  %4175 = vmatprep.mubr.msk.bf16.mxu1 %vm4789_vm1, %v4788_v24 }
  0xc7   :  { %4130 = vmatpush3.bf16.msra.mxu0 %v4473_v26 }
  0xc8   :  { %4174 = vmatpush3.bf16.msra.mxu1 %v4474_v28  ;;  %3202 = vmatprep.subr.bf16.mxu0 %v4477_v29  ;;  %v4555_v29 = vld [vmem:[%s6249_s3 + $0x514] ss:$36 sps:$4 sm:$0xff]  }
  0xc9   :  { %3243 = vmatprep.subr.bf16.mxu1 %v4525_v53 }
  0xca   :  { %1756 = vmatmul.mubr.bf16.vlgmr.msra.gmra.mxu0 %v5257_v18  ;;  %v4486_v18 = vld [vmem:[%s6249_s3 + $0x124] ss:$36 sps:$4 sm:$0xff]  }
  0xcb   :  { %4176 = vmatmul.mubr.msk.bf16.vlgmr.msra.gmra.mxu1 %vm1394_vm0, %v5282_v25  ;;  %3203 = vmatpush1.bf16.msra.mxu0 %v4475_v17  ;;  %v4484_v25 = vld [vmem:[%s6249_s3 + $0x120] ss:$36 sps:$4 sm:$0xff]   ;;  %v4553_v17 = vld [vmem:[%s6249_s3 + $0x510] ss:$36 sps:$4 sm:$0xff]  }
  0xcc   :  { %3275 = vmatprep.mubr.bf16.mxu1 %v4787_v27  ;;  %3204 = vmatprep.subr.bf16.mxu0 %v4480_v30  ;;  %v4561_v30 = vld [vmem:[%s6249_s3 + $0x4cc] ss:$36 sps:$4 sm:$0xff]  }
  0xcd   :  { %3244 = vmatpush1.bf16.msra.mxu1 %v4523_v52 }
  0xce   :  { %3245 = vmatprep.subr.bf16.mxu1 %v4531_v54 }
  0xcf   :  { %3205 = vmatpush1.bf16.msra.mxu0 %v4478_v31  ;;  %v4559_v31 = vld [vmem:[%s6249_s3 + $0x4c8] ss:$36 sps:$4 sm:$0xff]  }
  0xd0   :  { %3206 = vmatprep.subr.bf16.mxu0 %v4483_v47  ;;  %v4567_v47 = vld [vmem:[%s6249_s3 + $0x484] ss:$36 sps:$4 sm:$0xff]  }
  0xd1   :  { %3246 = vmatpush1.bf16.msra.mxu1 %v4529_v57 }
  0xd2   :  { %3247 = vmatprep.subr.bf16.mxu1 %v4537_v58  ;;  %v4534_v58 = vld [vmem:[%s6249_s3 + $0x63c] ss:$36 sps:$4 sm:$0xff]  }
  0xd3   :  { %3207 = vmatpush1.bf16.msra.mxu0 %v4481_v32  ;;  %v4565_v32 = vld [vmem:[%s6249_s3 + $0x480] ss:$36 sps:$4 sm:$0xff]  }
  0xd4   :  { %3208 = vmatprep.subr.bf16.mxu0 %v4486_v18  ;;  %v4573_v18 = vld [vmem:[%s6249_s3 + $0x204] ss:$36 sps:$4 sm:$0xff]  }
  0xd5   :  { %3248 = vmatpush1.bf16.msra.mxu1 %v4535_v6  ;;  %v4540_v6 = vld [vmem:[%s6249_s3 + $0x5f4] ss:$36 sps:$4 sm:$0xff]  }
  0xd6   :  { %3249 = vmatprep.subr.bf16.mxu1 %v4543_v7  ;;  %v4558_v7 = vld [vmem:[%s6249_s3 + $0x51c] ss:$36 sps:$4 sm:$0xff]  }
  0xd7   :  { %3209 = vmatpush1.bf16.msra.mxu0 %v4484_v25 }
  0xd8   :  { %3210 = vmatprep.subr.bf16.mxu0 %v4489_v33 }
  0xd9   :  { %3250 = vmatpush1.bf16.msra.mxu1 %v4541_v8  ;;  %v4556_v8 = vld [vmem:[%s6249_s3 + $0x518] ss:$36 sps:$4 sm:$0xff]  }
  0xda   :  { %3251 = vmatprep.subr.bf16.mxu1 %v4549_v15  ;;  %v4568_v15 = vld [vmem:[%s6249_s3 + $0x488] ss:$36 sps:$4 sm:$0xff]  }
  0xdb   :  { %3211 = vmatpush1.bf16.msra.mxu0 %v4487_v34 }
  0xdc   :  { %3212 = vmatprep.subr.bf16.mxu0 %v4492_v35 }
  0xdd   :  { %3252 = vmatpush1.bf16.msra.mxu1 %v4547_v20 }
  0xde   :  { %3253 = vmatprep.subr.bf16.mxu1 %v4555_v29 }
  0xdf   :  { %3213 = vmatpush1.bf16.msra.mxu0 %v4490_v38 }
  0xe0   :  { %3214 = vmatprep.subr.bf16.mxu0 %v4495_v39 }
  0xe1   :  { %3254 = vmatpush1.bf16.msra.mxu1 %v4553_v17 }
  0xe2   :  { %3255 = vmatprep.subr.bf16.mxu1 %v4561_v30 }
  0xe3   :  { %3215 = vmatpush1.bf16.msra.mxu0 %v4493_v40 }
  0xe4   :  { %3216 = vmatprep.subr.bf16.mxu0 %v4498_v51 }
  0xe5   :  { %3256 = vmatpush1.bf16.msra.mxu1 %v4559_v31 }
  0xe6   :  { %3257 = vmatprep.subr.bf16.mxu1 %v4567_v47 }
  0xe7   :  { %3217 = vmatpush1.bf16.msra.mxu0 %v4496_v41 }
  0xe8   :  { %3218 = vmatprep.subr.bf16.mxu0 %v4501_v42 }
  0xe9   :  { %3258 = vmatpush1.bf16.msra.mxu1 %v4565_v32 }
  0xea   :  { %3284 = vmatprep.subr.bf16.mxu1 %v4573_v18 }
  0xeb   :  { %3219 = vmatpush2.bf16.msra.mxu0 %v4499_v43 }
  0xec   :  { %3220 = vmatprep.subr.bf16.mxu0 %v4504_v44 }
  0xef   :  { %3221 = vmatpush2.bf16.msra.mxu0 %v4502_v45 }
  0xf0   :  { %3222 = vmatprep.subr.bf16.mxu0 %v4507_v46 }
  0xf3   :  { %3223 = vmatpush2.bf16.msra.mxu0 %v4505_v48 }
  0xf4   :  { %3224 = vmatprep.subr.bf16.mxu0 %v4510_v50 }
  0xf7   :  { %3225 = vmatpush2.bf16.msra.mxu0 %v4508_v55 }
  0xf8   :  { %3226 = vmatprep.subr.bf16.mxu0 %v4513_v56  ;;  %v4526_v56 = vld [vmem:[%s6249_s3 + $0x680] ss:$36 sps:$4 sm:$0xff]  }
  0xfb   :  { %3227 = vmatpush2.bf16.msra.mxu0 %v4511_v60  ;;  %v4532_v60 = vld [vmem:[%s6249_s3 + $0x638] ss:$36 sps:$4 sm:$0xff]  }
  0xfc   :  { %3228 = vmatprep.subr.bf16.mxu0 %v4516_v61  ;;  %v4538_v61 = vld [vmem:[%s6249_s3 + $0x5f0] ss:$36 sps:$4 sm:$0xff]  }
  0xff   :  { %3229 = vmatpush2.bf16.msra.mxu0 %v4514_v63  ;;  %v4546_v63 = vld [vmem:[%s6249_s3 + $0x5ac] ss:$36 sps:$4 sm:$0xff]  }
 0x100   :  { %3230 = vmatprep.subr.bf16.mxu0 %v4519_v0  ;;  %v4544_v0 = vld [vmem:[%s6249_s3 + $0x5a8] ss:$36 sps:$4 sm:$0xff]  }
 0x102   :  { %v1432_v9 = vpop.f32.mrf.mxu0 }
 0x103   :  { %v1473_v37 = vpop.f32.mrf.mxu1  ;;  %v1433_v10 = vadd.f32 %v1432_v9, %v295_v2  ;;  %3231 = vmatpush2.bf16.msra.mxu0 %v4517_v3  ;;  %v4552_v2 = vld [vmem:[%s6249_s3 + $0x564] ss:$36 sps:$4 sm:$0xff]  }
 0x104   :  { %v1434_v12 = vpop.f32.mrf.mxu0  ;;  %3232 = vmatprep.subr.bf16.mxu0 %v4522_v4  ;;  %v4550_v3 = vld [vmem:[%s6249_s3 + $0x560] ss:$36 sps:$4 sm:$0xff]  }
 0x105   :  { %v1475_v13 = vpop.f32.mrf.mxu1  ;;  %v1474_v16 = vadd.f32 %v1473_v37, %v1433_v10  ;;  %v1435_v19 = vadd.f32 %v1434_v12, %v299_v5  ;;  %v4564_v37 = vld [vmem:[%s6249_s3 + $0x4d4] ss:$36 sps:$4 sm:$0xff]  }
 0x106   :  { %v1436_v21 = vpop.f32.mrf.mxu0 }
 0x107   :  { %v1477_v22 = vpop.f32.mrf.mxu1  ;;  %v1476_v23 = vadd.f32 %v1475_v13, %v1435_v19  ;;  %3233 = vmatpush2.bf16.msra.mxu0 %v4520_v11  ;;  %v4562_v11 = vld [vmem:[%s6249_s3 + $0x4d0] ss:$36 sps:$4 sm:$0xff]   ;;  %v302_v21 = vsub.s32 2, %v5575_v59 }
 0x108   :  { %v1437_v26 = vpop.f32.mrf.mxu0  ;;  %3325 = vmatprep.subr.bf16.mxu0 %v4528_v14  ;;  %v4570_v13 = vld [vmem:[%s6249_s3 + $0x48c] ss:$36 sps:$4 sm:$0xff]  }
 0x109   :  { %v1478_v28 = vpop.f32.mrf.mxu1  ;;  %v4576_v19 = vld [vmem:[%s6249_s3 + $0x20c] ss:$36 sps:$4 sm:$0xff]  }
 0x142   :  { %v1514_v25 = vpop.f32.mrf.mxu0 }
 0x143   :  { %v1555_v33 = vpop.f32.mrf.mxu1  ;;  %v1515_v38 = vadd.f32 %v1514_v25, %v1474_v16 }
 0x144   :  { %v1516_v34 = vpop.f32.mrf.mxu0 }
 0x145   :  { %v1557_v35 = vpop.f32.mrf.mxu1  ;;  %v1517_v51 = vadd.f32 %v1516_v34, %v1476_v23  ;;  %v1556_v43 = vadd.f32 %v1555_v33, %v1515_v38  ;;  %v303_v23 = vrot.slane %v5593_v36, %v302_v21 }
 0x146   :  { %v1518_v39 = vpop.f32.mrf.mxu0 }
 0x147   :  { %v1559_v40 = vpop.f32.mrf.mxu1  ;;  %v1558_v45 = vadd.f32 %v1557_v35, %v1517_v51 }
 0x148   :  { %v1519_v41 = vpop.f32.mrf.mxu0 }
 0x149   :  { %v1560_v42 = vpop.f32.mrf.mxu1 }
 0x14a   :  { %v1596_v44 = vpop.f32.mrf.mxu0 }
 0x14b   :  { %v1597_v46 = vadd.f32 %v1596_v44, %v1556_v43  ;;  %v4571_v44 = vld [vmem:[%s6249_s3 + $0x200] ss:$36 sps:$4 sm:$0xff]  }
 0x14c   :  { %v1598_v48 = vpop.f32.mrf.mxu0 }
 0x14d   :  { %v1599_v49 = vadd.f32 %v1598_v48, %v1558_v45  ;;  %v1803_v50 = vmax.f32 %v1597_v46, 0.0  ;;  %v4574_v45 = vld [vmem:[%s6249_s3 + $0x208] ss:$36 sps:$4 sm:$0xff]   ;;  %v4579_v48 = vld [vmem:[%s6249_s3 + $0x1bc] ss:$36 sps:$4 sm:$0xff]  }
 0x14e   :  { %v1600_v52 = vpop.f32.mrf.mxu0 }
 0x14f   :  { %v1804_v53 = vmax.f32 %v1599_v49, 0.0  ;;  %v5655_v57 = vpack.c.bf16 %v1803_v50, %v1803_v50  ;;  %v4582_v49 = vld [vmem:[%s6249_s3 + $0x1c4] ss:$36 sps:$4 sm:$0xff]   ;;  %v4577_v50 = vld [vmem:[%s6249_s3 + $0x1b8] ss:$36 sps:$4 sm:$0xff]  }
 0x150   :  { %v1601_v54 = vpop.f32.mrf.mxu0  ;;  %v4580_v52 = vld [vmem:[%s6249_s3 + $0x1c0] ss:$36 sps:$4 sm:$0xff]  }
 0x151   :  { %v5650_v55 = vpack.c.bf16 %v1804_v53, %v1804_v53  ;;  %v4585_v53 = vld [vmem:[%s6249_s3 + $0x174] ss:$36 sps:$4 sm:$0xff]   ;;  %v4588_v54 = vld [vmem:[%s6249_s3 + $0x17c] ss:$36 sps:$4 sm:$0xff]  }
 0x153   :  { %3234 = vmatprep.mubr.bf16.mxu0 %v5650_v55 }
 0x154   :  { %3235 = vmatmul.mubr.bf16.vlgmr.msra.gmra.mxu0 %v5655_v57 }
 0x155   :  { %3326 = vmatpush1.bf16.msra.mxu0 %v4526_v56  ;;  %3357 = vmatprep.mubr.bf16.mxu0 %v4787_v27  ;;  %v4583_v56 = vld [vmem:[%s6249_s3 + $0x170] ss:$36 sps:$4 sm:$0xff]  }
 0x156   :  { %3327 = vmatprep.subr.bf16.mxu0 %v4534_v58  ;;  %v4586_v58 = vld [vmem:[%s6249_s3 + $0x178] ss:$36 sps:$4 sm:$0xff]  }
 0x159   :  { %3328 = vmatpush1.bf16.msra.mxu0 %v4532_v60  ;;  %v4591_v60 = vld [vmem:[%s6249_s3 + $0x12c] ss:$36 sps:$4 sm:$0xff]  }
 0x15a   :  { %3329 = vmatprep.subr.bf16.mxu0 %v4540_v6  ;;  %v4594_v6 = vld [vmem:[%s6249_s3 + $0x134] ss:$36 sps:$4 sm:$0xff]  }
 0x15d   :  { %3330 = vmatpush1.bf16.msra.mxu0 %v4538_v61  ;;  %v4589_v61 = vld [vmem:[%s6249_s3 + $0x128] ss:$36 sps:$4 sm:$0xff]  }
 0x15e   :  { %3331 = vmatprep.subr.bf16.mxu0 %v4546_v63  ;;  %v4592_v63 = vld [vmem:[%s6249_s3 + $0x130] ss:$36 sps:$4 sm:$0xff]  }
 0x161   :  { %3332 = vmatpush1.bf16.msra.mxu0 %v4544_v0  ;;  %v4597_v0 = vld [vmem:[%s6249_s3 + $0xe4] ss:$36 sps:$4 sm:$0xff]  }
 0x162   :  { %3333 = vmatprep.subr.bf16.mxu0 %v4552_v2  ;;  %v4600_v2 = vld [vmem:[%s6249_s3 + $0xec] ss:$36 sps:$4 sm:$0xff]  }
 0x163   :  { %v4065_v4 = vpop.f32.mrf.mxu1 }
 0x165   :  { %v4066_v5 = vpop.f32.mrf.mxu1  ;;  %3334 = vmatpush1.bf16.msra.mxu0 %v4550_v3  ;;  %v4595_v3 = vld [vmem:[%s6249_s3 + $0xe0] ss:$36 sps:$4 sm:$0xff]  }
 0x166   :  { %3335 = vmatprep.subr.bf16.mxu0 %v4558_v7  ;;  %v4067_v26 = vadd.f32 %v4066_v5, %v4065_v4  ;;  %v4598_v4 = vld [vmem:[%s6249_s3 + $0xe8] ss:$36 sps:$4 sm:$0xff]   ;;  %v4603_v7 = vld [vmem:[%s6249_s3 + $0x9c] ss:$36 sps:$4 sm:$0xff]  }
 0x167   :  { %v4068_v9 = vpop.f32.mrf.mxu1  ;;  %v4606_v5 = vld [vmem:[%s6249_s3 + $0xa4] ss:$36 sps:$4 sm:$0xff]  }
 0x168   :  { %v1638_v17 = vadd.f32 %v4067_v26, %v303_v23  ;;  %v4604_v9 = vld [vmem:[%s6249_s3 + $0xa0] ss:$36 sps:$4 sm:$0xff]   ;;  %v4622_v23 = vld [vmem:[%s6249_s3 + $0x448] ss:$36 sps:$4 sm:$0xff]  }
 0x169   :  { %v4069_v10 = vpop.f32.mrf.mxu1  ;;  %3336 = vmatpush1.bf16.msra.mxu0 %v4556_v8  ;;  %v4601_v8 = vld [vmem:[%s6249_s3 + $0x98] ss:$36 sps:$4 sm:$0xff]  }
 0x16a   :  { %v4087_v12 = vpop.f32.mrf.mxu0  ;;  %3337 = vmatprep.subr.bf16.mxu0 %v4564_v37  ;;  %v4609_v37 = vld [vmem:[%s6249_s3 + $0x54] ss:$36 sps:$4 sm:$0xff]   ;;  %v4612_v10 = vld [vmem:[%s6249_s3 + $0x5c] ss:$36 sps:$4 sm:$0xff]  }
 0x16b   :  { %v4627_v26 = vld [vmem:[%s6249_s3 + $0x3fc] ss:$36 sps:$4 sm:$0xff]  }
 0x16c   :  { %v4088_v14 = vpop.f32.mrf.mxu0 }
 0x16d   :  { %3338 = vmatpush1.bf16.msra.mxu0 %v4562_v11  ;;  %v4089_v30 = vadd.f32 %v4088_v14, %v4087_v12  ;;  %v4607_v11 = vld [vmem:[%s6249_s3 + $0x50] ss:$36 sps:$4 sm:$0xff]   ;;  %v4610_v12 = vld [vmem:[%s6249_s3 + $0x58] ss:$36 sps:$4 sm:$0xff]  }
 0x16e   :  { %v4090_v16 = vpop.f32.mrf.mxu0  ;;  %3339 = vmatprep.subr.bf16.mxu0 %v4570_v13  ;;  %v4615_v13 = vld [vmem:[%s6249_s3 + $0xc] ss:$36 sps:$4 sm:$0xff]   ;;  %v4618_v14 = vld [vmem:[%s6249_s3 + $0x14] ss:$36 sps:$4 sm:$0xff]  }
 0x16f   :  { %v1678_v25 = vadd.f32 %v4089_v30, %v1638_v17  ;;  %v4616_v16 = vld [vmem:[%s6249_s3 + $0x10] ss:$36 sps:$4 sm:$0xff]   ;;  %v4628_v17 = vld [vmem:[%s6249_s3 + $0x400] ss:$36 sps:$4 sm:$0xff]  }
 0x170   :  { %v4091_v20 = vpop.f32.mrf.mxu0  ;;  %v4633_v30 = vld [vmem:[%s6249_s3 + $0x3b4] ss:$36 sps:$4 sm:$0xff]  }
 0x171   :  { %3340 = vmatpush1.bf16.msra.mxu0 %v4568_v15  ;;  %v4613_v15 = vld [vmem:[%s6249_s3 + $0x8] ss:$36 sps:$4 sm:$0xff]  }
 0x172   :  { %3366 = vmatprep.subr.bf16.mxu0 %v4576_v19  ;;  %v4621_v19 = vld [vmem:[%s6249_s3 + $0x444] ss:$36 sps:$4 sm:$0xff]   ;;  %v4624_v20 = vld [vmem:[%s6249_s3 + $0x44c] ss:$36 sps:$4 sm:$0xff]  }
 0x183   :  { %v4109_v22 = vpop.f32.mrf.mxu1 }
 0x185   :  { %v4110_v28 = vpop.f32.mrf.mxu1 }
 0x186   :  { %v4111_v47 = vadd.f32 %v4110_v28, %v4109_v22  ;;  %v4619_v22 = vld [vmem:[%s6249_s3 + $0x440] ss:$36 sps:$4 sm:$0xff]  }
 0x187   :  { %v4112_v29 = vpop.f32.mrf.mxu1  ;;  %v4630_v28 = vld [vmem:[%s6249_s3 + $0x404] ss:$36 sps:$4 sm:$0xff]  }
 0x188   :  { %v1718_v35 = vadd.f32 %v4111_v47, %v1678_v25  ;;  %v4625_v29 = vld [vmem:[%s6249_s3 + $0x3f8] ss:$36 sps:$4 sm:$0xff]   ;;  %v4631_v47 = vld [vmem:[%s6249_s3 + $0x3b0] ss:$36 sps:$4 sm:$0xff]  }
 0x189   :  { %v4113_v31 = vpop.f32.mrf.mxu1  ;;  %v4642_v25 = vld [vmem:[%s6249_s3 + $0x374] ss:$36 sps:$4 sm:$0xff]  }
 0x18a   :  { %v4131_v32 = vpop.f32.mrf.mxu0  ;;  %v4636_v31 = vld [vmem:[%s6249_s3 + $0x3bc] ss:$36 sps:$4 sm:$0xff]  }
 0x18b   :  { %v1797_v18 = vpop.f32.mrf.mxu1 }
 0x18c   :  { %v4132_v33 = vpop.f32.mrf.mxu0 }
 0x18d   :  { %v4177_v34 = vpop.f32.mrf.mxu1  ;;  %v4133_v38 = vadd.f32 %v4132_v33, %v4131_v32  ;;  %v4634_v32 = vld [vmem:[%s6249_s3 + $0x3b8] ss:$36 sps:$4 sm:$0xff]   ;;  %v4637_v33 = vld [vmem:[%s6249_s3 + $0x368] ss:$36 sps:$4 sm:$0xff]  }
 0x18e   :  { %v4134_v39 = vpop.f32.mrf.mxu0  ;;  %v4640_v34 = vld [vmem:[%s6249_s3 + $0x370] ss:$36 sps:$4 sm:$0xff]  }
 0x18f   :  { %v1800_v40 = vpop.f32.mrf.mxu1  ;;  %v1758_v51 = vadd.f32 %v4133_v38, %v1718_v35  ;;  %v4645_v35 = vld [vmem:[%s6249_s3 + $0x324] ss:$36 sps:$4 sm:$0xff]   ;;  %v4648_v38 = vld [vmem:[%s6249_s3 + $0x32c] ss:$36 sps:$4 sm:$0xff]  }
 0x190   :  { %v4135_v41 = vpop.f32.mrf.mxu0  ;;  %v4643_v39 = vld [vmem:[%s6249_s3 + $0x320] ss:$36 sps:$4 sm:$0xff]   ;;  %v4646_v40 = vld [vmem:[%s6249_s3 + $0x328] ss:$36 sps:$4 sm:$0xff]  }
 0x191   :  { %v4178_v42 = vpop.f32.mrf.mxu1  ;;  %v1798_v36 = vadd.f32 %v1797_v18, %v1758_v51  ;;  %v4639_v18 = vld [vmem:[%s6249_s3 + $0x36c] ss:$36 sps:$4 sm:$0xff]   ;;  %v4651_v51 = vld [vmem:[%s6249_s3 + $0x2dc] ss:$36 sps:$4 sm:$0xff]   ;;  %v4654_v41 = vld [vmem:[%s6249_s3 + $0x2e4] ss:$36 sps:$4 sm:$0xff]  }
 0x192   :  { %v4649_v42 = vld [vmem:[%s6249_s3 + $0x2d8] ss:$36 sps:$4 sm:$0xff]  }
 0x193   :  { %v1805_v43 = vmax.f32 %v1798_v36, 0.0  ;;  %v4652_v36 = vld [vmem:[%s6249_s3 + $0x2e0] ss:$36 sps:$4 sm:$0xff]  }
 0x195   :  { %v5715_v46 = vpack.c.bf16 %v1805_v43, %v1805_v43  ;;  %v4657_v43 = vld [vmem:[%s6249_s3 + $0x294] ss:$36 sps:$4 sm:$0xff]  }
 0x197   :  { %3276 = vmatmul.mubr.bf16.vlgmr.msra.gmra.mxu1 %v5715_v46  ;;  %3358 = vmatmul.mubr.bf16.vlgmr.msra.gmra.mxu0 %v5715_v46 }
 0x198   :  { %3285 = vmatpush1.bf16.msra.mxu1 %v4571_v44  ;;  %3367 = vmatpush1.bf16.msra.mxu0 %v4574_v45  ;;  %v4660_v44 = vld [vmem:[%s6249_s3 + $0x29c] ss:$36 sps:$4 sm:$0xff]   ;;  %v4655_v45 = vld [vmem:[%s6249_s3 + $0x290] ss:$36 sps:$4 sm:$0xff]  }
 0x199   :  { %3316 = vmatprep.mubr.bf16.mxu1 %v5650_v55  ;;  %3398 = vmatprep.mubr.bf16.mxu0 %v5650_v55 }
 0x19a   :  { %3286 = vmatprep.subr.bf16.mxu1 %v4579_v48  ;;  %3368 = vmatprep.subr.bf16.mxu0 %v4582_v49  ;;  %v4658_v48 = vld [vmem:[%s6249_s3 + $0x298] ss:$36 sps:$4 sm:$0xff]   ;;  %v4663_v49 = vld [vmem:[%s6249_s3 + $0x24c] ss:$36 sps:$4 sm:$0xff]  }
 0x19c   :  { %3287 = vmatpush1.bf16.msra.mxu1 %v4577_v50  ;;  %3369 = vmatpush1.bf16.msra.mxu0 %v4580_v52  ;;  %v4666_v50 = vld [vmem:[%s6249_s3 + $0x254] ss:$36 sps:$4 sm:$0xff]   ;;  %v4661_v52 = vld [vmem:[%s6249_s3 + $0x248] ss:$36 sps:$4 sm:$0xff]  }
 0x19d   :  { %3288 = vmatprep.subr.bf16.mxu1 %v4585_v53  ;;  %3370 = vmatprep.subr.bf16.mxu0 %v4588_v54  ;;  %v4664_v53 = vld [vmem:[%s6249_s3 + $0x250] ss:$36 sps:$4 sm:$0xff]  }
 0x19e   :  { %v4669_v54 = vld [vmem:[%s6249_s3 + $0x68c] ss:$36 sps:$4 sm:$0xff]  }
 0x1a0   :  { %3289 = vmatpush1.bf16.msra.mxu1 %v4583_v56  ;;  %3371 = vmatpush1.bf16.msra.mxu0 %v4586_v58  ;;  %v4672_v56 = vld [vmem:[%s6249_s3 + $0x694] ss:$36 sps:$4 sm:$0xff]   ;;  %v4667_v58 = vld [vmem:[%s6249_s3 + $0x688] ss:$36 sps:$4 sm:$0xff]  }
 0x1a1   :  { %3290 = vmatprep.subr.bf16.mxu1 %v4591_v60  ;;  %3372 = vmatprep.subr.bf16.mxu0 %v4594_v6  ;;  %v4670_v60 = vld [vmem:[%s6249_s3 + $0x690] ss:$36 sps:$4 sm:$0xff]   ;;  %v4675_v6 = vld [vmem:[%s6249_s3 + $0x644] ss:$36 sps:$4 sm:$0xff]  }
 0x1a4   :  { %3291 = vmatpush1.bf16.msra.mxu1 %v4589_v61  ;;  %3373 = vmatpush1.bf16.msra.mxu0 %v4592_v63  ;;  %v4678_v61 = vld [vmem:[%s6249_s3 + $0x64c] ss:$36 sps:$4 sm:$0xff]   ;;  %v4673_v63 = vld [vmem:[%s6249_s3 + $0x640] ss:$36 sps:$4 sm:$0xff]  }
 0x1a5   :  { %3292 = vmatprep.subr.bf16.mxu1 %v4597_v0  ;;  %3374 = vmatprep.subr.bf16.mxu0 %v4600_v2  ;;  %v4676_v0 = vld [vmem:[%s6249_s3 + $0x648] ss:$36 sps:$4 sm:$0xff]   ;;  %v4681_v2 = vld [vmem:[%s6249_s3 + $0x5fc] ss:$36 sps:$4 sm:$0xff]  }
 0x1a8   :  { %3293 = vmatpush1.bf16.msra.mxu1 %v4595_v3  ;;  %3375 = vmatpush1.bf16.msra.mxu0 %v4598_v4  ;;  %v4684_v3 = vld [vmem:[%s6249_s3 + $0x604] ss:$36 sps:$4 sm:$0xff]   ;;  %v4679_v4 = vld [vmem:[%s6249_s3 + $0x5f8] ss:$36 sps:$4 sm:$0xff]  }
 0x1a9   :  { %3294 = vmatprep.subr.bf16.mxu1 %v4603_v7  ;;  %3376 = vmatprep.subr.bf16.mxu0 %v4606_v5  ;;  %v4682_v7 = vld [vmem:[%s6249_s3 + $0x600] ss:$36 sps:$4 sm:$0xff]   ;;  %v4687_v5 = vld [vmem:[%s6249_s3 + $0x5b4] ss:$36 sps:$4 sm:$0xff]  }
 0x1ac   :  { %3295 = vmatpush1.bf16.msra.mxu1 %v4601_v8  ;;  %3377 = vmatpush1.bf16.msra.mxu0 %v4604_v9  ;;  %v4685_v8 = vld [vmem:[%s6249_s3 + $0x5b0] ss:$36 sps:$4 sm:$0xff]   ;;  %v4688_v9 = vld [vmem:[%s6249_s3 + $0x5b8] ss:$36 sps:$4 sm:$0xff]  }
 0x1ad   :  { %3296 = vmatprep.subr.bf16.mxu1 %v4609_v37  ;;  %3378 = vmatprep.subr.bf16.mxu0 %v4612_v10  ;;  %v4693_v37 = vld [vmem:[%s6249_s3 + $0x56c] ss:$36 sps:$4 sm:$0xff]   ;;  %v4696_v10 = vld [vmem:[%s6249_s3 + $0x574] ss:$36 sps:$4 sm:$0xff]  }
 0x1b0   :  { %3297 = vmatpush1.bf16.msra.mxu1 %v4607_v11  ;;  %3379 = vmatpush1.bf16.msra.mxu0 %v4610_v12  ;;  %v4691_v11 = vld [vmem:[%s6249_s3 + $0x568] ss:$36 sps:$4 sm:$0xff]   ;;  %v4694_v12 = vld [vmem:[%s6249_s3 + $0x570] ss:$36 sps:$4 sm:$0xff]  }
 0x1b1   :  { %3298 = vmatprep.subr.bf16.mxu1 %v4615_v13  ;;  %3380 = vmatprep.subr.bf16.mxu0 %v4618_v14  ;;  %v4699_v13 = vld [vmem:[%s6249_s3 + $0x524] ss:$36 sps:$4 sm:$0xff]   ;;  %v4702_v14 = vld [vmem:[%s6249_s3 + $0x52c] ss:$36 sps:$4 sm:$0xff]  }
 0x1b4   :  { %3299 = vmatpush1.bf16.msra.mxu1 %v4613_v15  ;;  %3381 = vmatpush1.bf16.msra.mxu0 %v4616_v16  ;;  %v4697_v15 = vld [vmem:[%s6249_s3 + $0x520] ss:$36 sps:$4 sm:$0xff]   ;;  %v4700_v16 = vld [vmem:[%s6249_s3 + $0x528] ss:$36 sps:$4 sm:$0xff]  }
 0x1b5   :  { %3300 = vmatprep.subr.bf16.mxu1 %v4621_v19  ;;  %3382 = vmatprep.subr.bf16.mxu0 %v4624_v20  ;;  %v4705_v19 = vld [vmem:[%s6249_s3 + $0x4dc] ss:$36 sps:$4 sm:$0xff]   ;;  %v4708_v20 = vld [vmem:[%s6249_s3 + $0x4e4] ss:$36 sps:$4 sm:$0xff]  }
 0x1b8   :  { %3301 = vmatpush2.bf16.msra.mxu1 %v4619_v22  ;;  %3383 = vmatpush2.bf16.msra.mxu0 %v4622_v23  ;;  %v4703_v22 = vld [vmem:[%s6249_s3 + $0x4d8] ss:$36 sps:$4 sm:$0xff]   ;;  %v4706_v23 = vld [vmem:[%s6249_s3 + $0x4e0] ss:$36 sps:$4 sm:$0xff]  }
 0x1b9   :  { %3302 = vmatprep.subr.bf16.mxu1 %v4627_v26  ;;  %3384 = vmatprep.subr.bf16.mxu0 %v4630_v28  ;;  %v4711_v26 = vld [vmem:[%s6249_s3 + $0x494] ss:$36 sps:$4 sm:$0xff]   ;;  %v4714_v28 = vld [vmem:[%s6249_s3 + $0x49c] ss:$36 sps:$4 sm:$0xff]  }
 0x1bc   :  { %3303 = vmatpush2.bf16.msra.mxu1 %v4625_v29  ;;  %3385 = vmatpush2.bf16.msra.mxu0 %v4628_v17  ;;  %v4709_v29 = vld [vmem:[%s6249_s3 + $0x490] ss:$36 sps:$4 sm:$0xff]   ;;  %v4712_v17 = vld [vmem:[%s6249_s3 + $0x498] ss:$36 sps:$4 sm:$0xff]  }
 0x1bd   :  { %3304 = vmatprep.subr.bf16.mxu1 %v4633_v30  ;;  %3386 = vmatprep.subr.bf16.mxu0 %v4636_v31  ;;  %v4717_v30 = vld [vmem:[%s6249_s3 + $0x214] ss:$36 sps:$4 sm:$0xff]  }
 0x1be   :  { %v4718_v31 = vld [vmem:[%s6249_s3 + $0x458] ss:$36 sps:$4 sm:$0xff]  }
 0x1c0   :  { %3305 = vmatpush2.bf16.msra.mxu1 %v4631_v47  ;;  %3387 = vmatpush2.bf16.msra.mxu0 %v4634_v32  ;;  %v4715_v47 = vld [vmem:[%s6249_s3 + $0x210] ss:$36 sps:$4 sm:$0xff]   ;;  %v4719_v32 = vld [vmem:[%s6249_s3 + $0x218] ss:$36 sps:$4 sm:$0xff]  }
 0x1c1   :  { %3306 = vmatprep.subr.bf16.mxu1 %v4639_v18  ;;  %3388 = vmatprep.subr.bf16.mxu0 %v4642_v25  ;;  %v4722_v18 = vld [vmem:[%s6249_s3 + $0x1cc] ss:$36 sps:$4 sm:$0xff]  }
 0x1c2   :  { %v4723_v25 = vld [vmem:[%s6249_s3 + $0x410] ss:$36 sps:$4 sm:$0xff]  }
 0x1c4   :  { %3307 = vmatpush2.bf16.msra.mxu1 %v4637_v33  ;;  %3389 = vmatpush2.bf16.msra.mxu0 %v4640_v34  ;;  %v4720_v33 = vld [vmem:[%s6249_s3 + $0x1c8] ss:$36 sps:$4 sm:$0xff]   ;;  %v4724_v34 = vld [vmem:[%s6249_s3 + $0x1d0] ss:$36 sps:$4 sm:$0xff]  }
 0x1c5   :  { %3308 = vmatprep.subr.bf16.mxu1 %v4645_v35  ;;  %3390 = vmatprep.subr.bf16.mxu0 %v4648_v38  ;;  %v4727_v35 = vld [vmem:[%s6249_s3 + $0x184] ss:$36 sps:$4 sm:$0xff]  }
 0x1c6   :  { %v4728_v38 = vld [vmem:[%s6249_s3 + $0x3c8] ss:$36 sps:$4 sm:$0xff]  }
 0x1c8   :  { %3309 = vmatpush2.bf16.msra.mxu1 %v4643_v39  ;;  %3391 = vmatpush2.bf16.msra.mxu0 %v4646_v40  ;;  %v4725_v39 = vld [vmem:[%s6249_s3 + $0x180] ss:$36 sps:$4 sm:$0xff]  }
 0x1c9   :  { %3310 = vmatprep.subr.bf16.mxu1 %v4651_v51  ;;  %3392 = vmatprep.subr.bf16.mxu0 %v4654_v41  ;;  %v4732_v40 = vld [vmem:[%s6249_s3 + $0x13c] ss:$36 sps:$4 sm:$0xff]  }
 0x1ca   :  { %v4733_v51 = vld [vmem:[%s6249_s3 + $0x380] ss:$36 sps:$4 sm:$0xff]   ;;  %v4730_v41 = vld [vmem:[%s6249_s3 + $0x138] ss:$36 sps:$4 sm:$0xff]  }
 0x1cc   :  { %3311 = vmatpush2.bf16.msra.mxu1 %v4649_v42  ;;  %3393 = vmatpush2.bf16.msra.mxu0 %v4652_v36  ;;  %v4734_v42 = vld [vmem:[%s6249_s3 + $0x140] ss:$36 sps:$4 sm:$0xff]   ;;  %v4737_v36 = vld [vmem:[%s6249_s3 + $0xf4] ss:$36 sps:$4 sm:$0xff]  }
 0x1cd   :  { %3312 = vmatprep.subr.bf16.mxu1 %v4657_v43  ;;  %3394 = vmatprep.subr.bf16.mxu0 %v4660_v44  ;;  %v4738_v43 = vld [vmem:[%s6249_s3 + $0x338] ss:$36 sps:$4 sm:$0xff]   ;;  %v4735_v44 = vld [vmem:[%s6249_s3 + $0xf0] ss:$36 sps:$4 sm:$0xff]  }
 0x1d0   :  { %3313 = vmatpush2.bf16.msra.mxu1 %v4655_v45  ;;  %3395 = vmatpush2.bf16.msra.mxu0 %v4658_v48  ;;  %v4739_v45 = vld [vmem:[%s6249_s3 + $0xf8] ss:$36 sps:$4 sm:$0xff]   ;;  %v4742_v48 = vld [vmem:[%s6249_s3 + $0xac] ss:$36 sps:$4 sm:$0xff]  }
 0x1d1   :  { %3314 = vmatprep.subr.bf16.mxu1 %v4663_v49  ;;  %3396 = vmatprep.subr.bf16.mxu0 %v4666_v50  ;;  %v4743_v49 = vld [vmem:[%s6249_s3 + $0x2f0] ss:$36 sps:$4 sm:$0xff]   ;;  %v4740_v50 = vld [vmem:[%s6249_s3 + $0xa8] ss:$36 sps:$4 sm:$0xff]  }
 0x1d4   :  { %3315 = vmatpush2.bf16.msra.mxu1 %v4661_v52  ;;  %3397 = vmatpush2.bf16.msra.mxu0 %v4664_v53  ;;  %v4744_v52 = vld [vmem:[%s6249_s3 + $0xb0] ss:$36 sps:$4 sm:$0xff]   ;;  %v4747_v53 = vld [vmem:[%s6249_s3 + $0x64] ss:$36 sps:$4 sm:$0xff]  }
 0x1d5   :  { %3407 = vmatprep.subr.bf16.mxu1 %v4669_v54  ;;  %3489 = vmatprep.subr.bf16.mxu0 %v4672_v56  ;;  %v4748_v54 = vld [vmem:[%s6249_s3 + $0x2a8] ss:$36 sps:$4 sm:$0xff]   ;;  %v4745_v56 = vld [vmem:[%s6249_s3 + $0x60] ss:$36 sps:$4 sm:$0xff]  }
 0x1d7   :  { %3317 = vmatmul.mubr.bf16.vlgmr.msra.gmra.mxu1 %v5655_v57  ;;  %3399 = vmatmul.mubr.bf16.vlgmr.msra.gmra.mxu0 %v5655_v57 }
 0x1d8   :  { %3408 = vmatpush1.bf16.msra.mxu1 %v4667_v58  ;;  %3490 = vmatpush1.bf16.msra.mxu0 %v4670_v60  ;;  %v4749_v58 = vld [vmem:[%s6249_s3 + $0x68] ss:$36 sps:$4 sm:$0xff]   ;;  %v4752_v60 = vld [vmem:[%s6249_s3 + $0x1c] ss:$36 sps:$4 sm:$0xff]  }
 0x1d9   :  { %3409 = vmatprep.subr.bf16.mxu1 %v4675_v6  ;;  %3491 = vmatprep.subr.bf16.mxu0 %v4678_v61  ;;  %v4753_v6 = vld [vmem:[%s6249_s3 + $0x260] ss:$36 sps:$4 sm:$0xff]   ;;  %v4750_v61 = vld [vmem:[%s6249_s3 + $0x18] ss:$36 sps:$4 sm:$0xff]  }
 0x1da   :  { %3439 = vmatprep.mubr.bf16.mxu1 %v4787_v27  ;;  %3521 = vmatprep.mubr.bf16.mxu0 %v4787_v27  ;;  %v4690_v27 = vld [vmem:[%s6249_s3 + $0x5bc] ss:$36 sps:$4 sm:$0xff]  }
 0x1dc   :  { %3410 = vmatpush1.bf16.msra.mxu1 %v4673_v63  ;;  %3492 = vmatpush1.bf16.msra.mxu0 %v4676_v0  ;;  %v4754_v63 = vld [vmem:[%s6249_s3 + $0x20] ss:$36 sps:$4 sm:$0xff]   ;;  %v4757_v0 = vld [vmem:[%s6249_s3 + $0x454] ss:$36 sps:$4 sm:$0xff]  }
 0x1dd   :  { %3411 = vmatprep.subr.bf16.mxu1 %v4681_v2  ;;  %3493 = vmatprep.subr.bf16.mxu0 %v4684_v3  ;;  %v4755_v3 = vld [vmem:[%s6249_s3 + $0x450] ss:$36 sps:$4 sm:$0xff]  }
 0x1e0   :  { %3412 = vmatpush1.bf16.msra.mxu1 %v4679_v4  ;;  %3494 = vmatpush1.bf16.msra.mxu0 %v4682_v7  ;;  %v4760_v4 = vld [vmem:[%s6249_s3 + $0x40c] ss:$36 sps:$4 sm:$0xff]  }
 0x1e1   :  { %3413 = vmatprep.subr.bf16.mxu1 %v4687_v5  ;;  %3495 = vmatprep.subr.bf16.mxu0 %v4690_v27  ;;  %v4758_v27 = vld [vmem:[%s6249_s3 + $0x408] ss:$36 sps:$4 sm:$0xff]  }
 0x1e4   :  { %3414 = vmatpush1.bf16.msra.mxu1 %v4685_v8  ;;  %3496 = vmatpush1.bf16.msra.mxu0 %v4688_v9  ;;  %v4763_v8 = vld [vmem:[%s6249_s3 + $0x3c4] ss:$36 sps:$4 sm:$0xff]  }
 0x1e5   :  { %3415 = vmatprep.subr.bf16.mxu1 %v4693_v37  ;;  %3497 = vmatprep.subr.bf16.mxu0 %v4696_v10  ;;  %v4761_v37 = vld [vmem:[%s6249_s3 + $0x3c0] ss:$36 sps:$4 sm:$0xff]  }
 0x1e6   :  { %v4766_v10 = vld [vmem:[%s6249_s3 + $0x37c] ss:$36 sps:$4 sm:$0xff]  }
 0x1e8   :  { %3416 = vmatpush1.bf16.msra.mxu1 %v4691_v11  ;;  %3498 = vmatpush1.bf16.msra.mxu0 %v4694_v12  ;;  %v4764_v11 = vld [vmem:[%s6249_s3 + $0x378] ss:$36 sps:$4 sm:$0xff]  }
 0x1e9   :  { %3417 = vmatprep.subr.bf16.mxu1 %v4699_v13  ;;  %3499 = vmatprep.subr.bf16.mxu0 %v4702_v14  ;;  %v4769_v12 = vld [vmem:[%s6249_s3 + $0x334] ss:$36 sps:$4 sm:$0xff]   ;;  %v4772_v14 = vld [vmem:[%s6249_s3 + $0x2ec] ss:$36 sps:$4 sm:$0xff]  }
 0x1ea   :  { %v4767_v13 = vld [vmem:[%s6249_s3 + $0x330] ss:$36 sps:$4 sm:$0xff]  }
 0x1ec   :  { %3418 = vmatpush1.bf16.msra.mxu1 %v4697_v15  ;;  %3500 = vmatpush1.bf16.msra.mxu0 %v4700_v16  ;;  %v4770_v15 = vld [vmem:[%s6249_s3 + $0x2e8] ss:$36 sps:$4 sm:$0xff]  }
 0x1ed   :  { %3419 = vmatprep.subr.bf16.mxu1 %v4705_v19  ;;  %3501 = vmatprep.subr.bf16.mxu0 %v4708_v20  ;;  %v4775_v16 = vld [vmem:[%s6249_s3 + $0x2a4] ss:$36 sps:$4 sm:$0xff]   ;;  %v4778_v20 = vld [vmem:[%s6249_s3 + $0x25c] ss:$36 sps:$4 sm:$0xff]  }
 0x1ee   :  { %v4773_v19 = vld [vmem:[%s6249_s3 + $0x2a0] ss:$36 sps:$4 sm:$0xff]  }
 0x1f0   :  { %3420 = vmatpush1.bf16.msra.mxu1 %v4703_v22  ;;  %3502 = vmatpush1.bf16.msra.mxu0 %v4706_v23  ;;  %v4776_v22 = vld [vmem:[%s6249_s3 + $0x258] ss:$36 sps:$4 sm:$0xff]  }
 0x1f1   :  { %3421 = vmatprep.subr.bf16.mxu1 %v4711_v26  ;;  %3503 = vmatprep.subr.bf16.mxu0 %v4714_v28  ;;  %v4779_v23 = vld [vmem:[%s6249_s3 + $0x698] ss:$36 sps:$4 sm:$0xff]   ;;  %v4780_v26 = vld [vmem:[%s6249_s3 + $0x650] ss:$36 sps:$4 sm:$0xff]   ;;  %v4781_v28 = vld [vmem:[%s6249_s3 + $0x608] ss:$36 sps:$4 sm:$0xff]  }
 0x1f4   :  { %3422 = vmatpush1.bf16.msra.mxu1 %v4709_v29  ;;  %3504 = vmatpush1.bf16.msra.mxu0 %v4712_v17  ;;  %v4783_v29 = vld [vmem:[%s6249_s3 + $0x578] ss:$36 sps:$4 sm:$0xff]   ;;  %v4784_v17 = vld [vmem:[%s6249_s3 + $0x530] ss:$36 sps:$4 sm:$0xff]  }
 0x1f5   :  { %3448 = vmatprep.subr.bf16.mxu1 %v4717_v30  ;;  %4140 = vmatprep.subr.bf16.mxu0 %v4718_v31  ;;  %v4785_v30 = vld [vmem:[%s6249_s3 + $0x4e8] ss:$36 sps:$4 sm:$0xff]   ;;  %v6188_v31 = vld [vmem:[%s6251_s4] sm:$0xff] }
 0x1f7   :  { %3440 = vmatmul.mubr.bf16.vlgmr.msra.gmra.mxu1 %v5715_v46  ;;  %3522 = vmatmul.mubr.bf16.vlgmr.msra.gmra.mxu0 %v5715_v46 }
 0x1f8   :  { %3449 = vmatpush1.bf16.msra.mxu1 %v4715_v47  ;;  %3480 = vmatprep.mubr.bf16.mxu1 %v5650_v55  ;;  %v4786_v47 = vld [vmem:[%s6249_s3 + $0x4a0] ss:$36 sps:$4 sm:$0xff]  }
 0x1f9   :  { %4141 = vmatpush3.bf16.msra.mxu0 %v4719_v32  ;;  %3562 = vmatprep.mubr.bf16.mxu0 %v5650_v55  ;;  %v4729_v55 = vld [vmem:[%s6249_s3 + $0x188] ss:$36 sps:$4 sm:$0xff]   ;;  %v2056_v32 = vrot.slane %v6188_v31, %v294_v62 }
 0x1fa   :  { %3450 = vmatprep.subr.bf16.mxu1 %v4722_v18  ;;  %4142 = vmatprep.subr.bf16.mxu0 %v4723_v25  ;;  %v2060_v18 = vrot.slane %v6188_v31, %v298_v1 }
 0x1fc   :  { %3451 = vmatpush1.bf16.msra.mxu1 %v4720_v33 }
 0x1fd   :  { %4143 = vmatpush3.bf16.msra.mxu0 %v4724_v34  ;;  %3452 = vmatprep.subr.bf16.mxu1 %v4727_v35 }
 0x1fe   :  { %4144 = vmatprep.subr.bf16.mxu0 %v4728_v38 }
 0x200   :  { %3453 = vmatpush1.bf16.msra.mxu1 %v4725_v39 }
 0x201   :  { %4145 = vmatpush3.bf16.msra.mxu0 %v4729_v55  ;;  %3454 = vmatprep.subr.bf16.mxu1 %v4732_v40 }
 0x202   :  { %4146 = vmatprep.subr.bf16.mxu0 %v4733_v51  ;;  %v2067_v51 = vsub.s32 3, %v5575_v59 }
 0x204   :  { %3455 = vmatpush1.bf16.msra.mxu1 %v4730_v41  ;;  %v2064_v41 = vrot.slane %v6188_v31, %v302_v21  ;;  %v2071_v21 = vsub.s32 4, %v5575_v59 }
 0x205   :  { %4147 = vmatpush3.bf16.msra.mxu0 %v4734_v42  ;;  %3456 = vmatprep.subr.bf16.mxu1 %v4737_v36  ;;  %v2068_v42 = vrot.slane %v6188_v31, %v2067_v51 }
 0x206   :  { %4148 = vmatprep.subr.bf16.mxu0 %v4738_v43 }
 0x208   :  { %3457 = vmatpush1.bf16.msra.mxu1 %v4735_v44 }
 0x209   :  { %4149 = vmatpush3.bf16.msra.mxu0 %v4739_v45  ;;  %3458 = vmatprep.subr.bf16.mxu1 %v4742_v48 }
 0x20a   :  { %4150 = vmatprep.subr.bf16.mxu0 %v4743_v49 }
 0x20c   :  { %3459 = vmatpush1.bf16.msra.mxu1 %v4740_v50 }
 0x20d   :  { %4151 = vmatpush3.bf16.msra.mxu0 %v4744_v52  ;;  %3460 = vmatprep.subr.bf16.mxu1 %v4747_v53 }
 0x20e   :  { %4152 = vmatprep.subr.bf16.mxu0 %v4748_v54 }
 0x210   :  { %3461 = vmatpush1.bf16.msra.mxu1 %v4745_v56 }
 0x211   :  { %4153 = vmatpush3.bf16.msra.mxu0 %v4749_v58  ;;  %3462 = vmatprep.subr.bf16.mxu1 %v4752_v60  ;;  %v2075_v60 = vsub.s32 5, %v5575_v59 }
 0x212   :  { %4154 = vmatprep.subr.bf16.mxu0 %v4753_v6  ;;  %v2072_v6 = vrot.slane %v6188_v31, %v2071_v21 }
 0x214   :  { %3463 = vmatpush1.bf16.msra.mxu1 %v4750_v61  ;;  %v6104_v2 = vpop.f32.mrf.mxu0  ;;  %v2076_v61 = vrot.slane %v6188_v31, %v2075_v60 }
 0x215   :  { %4155 = vmatpush3.bf16.msra.mxu0 %v4754_v63  ;;  %3464 = vmatprep.subr.bf16.mxu1 %v4757_v0  ;;  %v3237_v25 = vadd.f32 %v6104_v2, %v2056_v32 }
 0x216   :  { %v6112_v7 = vpop.f32.mrf.mxu0 }
 0x217   :  { %v3239_v35 = vadd.f32 %v6112_v7, %v2060_v18 }
 0x218   :  { %3563 = vmatmul.mubr.bf16.vlgmr.msra.gmra.mxu0 %v5655_v57  ;;  %3465 = vmatpush2.bf16.msra.mxu1 %v4755_v3  ;;  %v3240_v5 = vpop.f32.mrf.mxu0 }
 0x219   :  { %3466 = vmatprep.subr.bf16.mxu1 %v4760_v4 }
 0x21a   :  { %v3241_v9 = vpop.f32.mrf.mxu0 }
 0x21c   :  { %3467 = vmatpush2.bf16.msra.mxu1 %v4758_v27 }
 0x21d   :  { %3468 = vmatprep.subr.bf16.mxu1 %v4763_v8 }
 0x220   :  { %3469 = vmatpush2.bf16.msra.mxu1 %v4761_v37 }
 0x221   :  { %3470 = vmatprep.subr.bf16.mxu1 %v4766_v10 }
 0x224   :  { %3471 = vmatpush2.bf16.msra.mxu1 %v4764_v11 }
 0x225   :  { %3472 = vmatprep.subr.bf16.mxu1 %v4769_v12 }
 0x228   :  { %3473 = vmatpush2.bf16.msra.mxu1 %v4767_v13 }
 0x229   :  { %3474 = vmatprep.subr.bf16.mxu1 %v4772_v14 }
 0x22c   :  { %3475 = vmatpush2.bf16.msra.mxu1 %v4770_v15  ;;  %v2079_v15 = vsub.s32 6, %v5575_v59 }
 0x22d   :  { %3476 = vmatprep.subr.bf16.mxu1 %v4775_v16  ;;  %v2083_v16 = vsub.s32 7, %v5575_v59 }
 0x230   :  { %3477 = vmatpush2.bf16.msra.mxu1 %v4773_v19  ;;  %v2080_v19 = vrot.slane %v6188_v31, %v2079_v15 }
 0x231   :  { %3478 = vmatprep.subr.bf16.mxu1 %v4778_v20  ;;  %v2084_v20 = vrot.slane %v6188_v31, %v2083_v16  ;;  %v3832_v31 = vld [vmem:[%s6251_s4 + $0x8] ss:$0 sm:$0xff] }
 0x234   :  { %3479 = vmatpush2.bf16.msra.mxu1 %v4776_v22 }
 0x235   :  { %4179 = vmatprep.subr.bf16.mxu1 %v4788_v24 }
 0x237   :  { %3481 = vmatmul.mubr.bf16.vlgmr.msra.gmra.mxu1 %v5655_v57  ;;  %v4782_v57 = vld [vmem:[%s6249_s3 + $0x5c0] ss:$36 sps:$4 sm:$0xff]  }
 0x238   :  { %4180 = vmatpush3.bf16.msra.mxu1 %v4779_v23  ;;  %4195 = vmatprep.mubr.msk.bf16.mxu1 %vm4789_vm1, %v4788_v24 }
 0x239   :  { %4181 = vmatprep.subr.bf16.mxu1 %v4788_v24 }
 0x23c   :  { %4182 = vmatpush3.bf16.msra.mxu1 %v4780_v26 }
 0x23d   :  { %4183 = vmatprep.subr.bf16.mxu1 %v4788_v24 }
 0x240   :  { %4184 = vmatpush3.bf16.msra.mxu1 %v4781_v28 }
 0x241   :  { %4185 = vmatprep.subr.bf16.mxu1 %v4788_v24 }
 0x244   :  { %4186 = vmatpush3.bf16.msra.mxu1 %v4782_v57 }
 0x245   :  { %4187 = vmatprep.subr.bf16.mxu1 %v4788_v24 }
 0x248   :  { %4188 = vmatpush3.bf16.msra.mxu1 %v4783_v29 }
 0x249   :  { %4189 = vmatprep.subr.bf16.mxu1 %v4788_v24 }
 0x24c   :  { %4190 = vmatpush3.bf16.msra.mxu1 %v4784_v17 }
 0x24d   :  { %4191 = vmatprep.subr.bf16.mxu1 %v4788_v24 }
 0x250   :  { %4192 = vmatpush3.bf16.msra.mxu1 %v4785_v30 }
 0x251   :  { %4193 = vmatprep.subr.bf16.mxu1 %v4788_v24 }
 0x254   :  { %4194 = vmatpush3.bf16.msra.mxu1 %v4786_v47 }
 0x257   :  { %4196 = vmatmul.mubr.bf16.vlgmr.msra.gmra.mxu1 %v5715_v46  ;;  %v3277_v33 = vpop.f32.mrf.mxu1  ;;  %v3359_v34 = vpop.f32.mrf.mxu0 }
 0x258   :  { %v3278_v38 = vadd.f32 %v3277_v33, %v3237_v25 }
 0x259   :  { %v3279_v39 = vpop.f32.mrf.mxu1  ;;  %v3361_v24 = vpop.f32.mrf.mxu0 }
 0x25a   :  { %3610 = vst [vmem:[%s6252_s5] sm:$0xff] %v3278_v38  ;;  %v3280_v62 = vadd.f32 %v3279_v39, %v3239_v35 }
 0x25b   :  { %v3281_v55 = vpop.f32.mrf.mxu1  ;;  %v3363_v40 = vpop.f32.mrf.mxu0 }
 0x25c   :  { %3611 = vst [vmem:[%s6252_s5 + $0x8] sm:$0xff] %v3280_v62 }
 0x25d   :  { %v3282_v1 = vpop.f32.mrf.mxu1  ;;  %v3364_v46 = vpop.f32.mrf.mxu0 }
 0x297   :  { %v3318_v36 = vpop.f32.mrf.mxu1  ;;  %v3400_v43 = vpop.f32.mrf.mxu0 }
 0x298   :  { %v3319_v44 = vadd.f32 %v3318_v36, %v2064_v41  ;;  %v3401_v63 = vadd.f32 %v3400_v43, %v2072_v6 }
 0x299   :  { %v3320_v45 = vpop.f32.mrf.mxu1  ;;  %v3402_v48 = vpop.f32.mrf.mxu0 }
 0x29a   :  { %v3360_v49 = vadd.f32 %v3359_v34, %v3319_v44  ;;  %v3321_v50 = vadd.f32 %v3320_v45, %v2068_v42  ;;  %v3403_v3 = vadd.f32 %v3402_v48, %v2076_v61 }
 0x29b   :  { %v3322_v52 = vpop.f32.mrf.mxu1  ;;  %v3404_v53 = vpop.f32.mrf.mxu0 }
 0x29c   :  { %3612 = vst [vmem:[%s6252_s5 + $0x10] sm:$0xff] %v3360_v49  ;;  %v3362_v54 = vadd.f32 %v3361_v24, %v3321_v50 }
 0x29d   :  { %v3323_v56 = vpop.f32.mrf.mxu1  ;;  %v3405_v58 = vpop.f32.mrf.mxu0 }
 0x29e   :  { %3613 = vst [vmem:[%s6252_s5 + $0x18] sm:$0xff] %v3362_v54 }
 0x2b7   :  { %v3441_v0 = vpop.f32.mrf.mxu1  ;;  %v3523_v2 = vpop.f32.mrf.mxu0 }
 0x2b8   :  { %v3442_v4 = vadd.f32 %v3441_v0, %v3401_v63 }
 0x2b9   :  { %v3443_v7 = vpop.f32.mrf.mxu1  ;;  %v3525_v5 = vpop.f32.mrf.mxu0 }
 0x2ba   :  { %3614 = vst [vmem:[%s6252_s5 + $0x20] sm:$0xff] %v3442_v4  ;;  %v3444_v27 = vadd.f32 %v3443_v7, %v3403_v3 }
 0x2bb   :  { %v3445_v8 = vpop.f32.mrf.mxu1  ;;  %v3527_v9 = vpop.f32.mrf.mxu0 }
 0x2bc   :  { %3615 = vst [vmem:[%s6252_s5 + $0x28] sm:$0xff] %v3444_v27 }
 0x2bd   :  { %v3446_v37 = vpop.f32.mrf.mxu1  ;;  %v3528_v10 = vpop.f32.mrf.mxu0 }
 0x2d8   :  { %v4156_v11 = vpop.f32.mrf.mxu0 }
 0x2da   :  { %v4157_v12 = vpop.f32.mrf.mxu0 }
 0x2db   :  { %v4158_v59 = vadd.f32 %v4157_v12, %v4156_v11 }
 0x2dc   :  { %v4159_v13 = vpop.f32.mrf.mxu0 }
 0x2dd   :  { %v3565_v47 = vadd.f32 %v4158_v59, %v3832_v31 }
 0x2de   :  { %v4160_v14 = vpop.f32.mrf.mxu0 }
 0x2f7   :  { %v3482_v22 = vpop.f32.mrf.mxu1 }
 0x2f8   :  { %v3483_v23 = vadd.f32 %v3482_v22, %v2080_v19 }
 0x2f9   :  { %v3484_v26 = vpop.f32.mrf.mxu1 }
 0x2fa   :  { %v3524_v28 = vadd.f32 %v3523_v2, %v3483_v23  ;;  %v3485_v57 = vadd.f32 %v3484_v26, %v2084_v20 }
 0x2fb   :  { %v3486_v29 = vpop.f32.mrf.mxu1 }
 0x2fc   :  { %3616 = vst [vmem:[%s6252_s5 + $0x30] sm:$0xff] %v3524_v28  ;;  %v3526_v17 = vadd.f32 %v3525_v5, %v3485_v57 }
 0x2fd   :  { %v3487_v30 = vpop.f32.mrf.mxu1 }
 0x2fe   :  { %3617 = vst [vmem:[%s6252_s5 + $0x38] sm:$0xff] %v3526_v17 }
 0x317   :  { %v3604_v32 = vpop.f32.mrf.mxu1 }
 0x318   :  { %v3605_v18 = vadd.f32 %v3604_v32, %v3565_v47 }
 0x319   :  { %v4197_v25 = vpop.f32.mrf.mxu1 }
 0x31a   :  { %3618 = vst.msk [vmem:[%s6252_s5 + $0x40] sm:$0xff] %vm1394_vm0, %v3605_v18 }
 0x31b   :  { %v3607_v33 = vpop.f32.mrf.mxu1 }
 0x31d   :  { %v4198_v34 = vpop.f32.mrf.mxu1 }

</bundles_post_ra>
